<compile_context>
chip_gen: v5e
topology: v5e:2x2
jax: 0.10.0
libtpu: 0.0.40
codegen_flags: <defaults>
</compile_context>

<pallas_src>
import functools

import jax
import jax.numpy as jnp
from jax.experimental import pallas as pl
from jax.experimental.pallas import tpu as pltpu

EPS = 1e-5
_ROW_TILE = 1024                      # rows per grid step for elementwise kernels


def _vmem_limit_bytes():
    # Per-generation scoped-VMEM budget: ~96 MiB on v5e/v6e (128 MiB physical),
    # ~48 MiB on v7x (64 MiB physical); conservative fallback if the query fails.
    try:
        cap = int(pltpu.get_tpu_info().vmem_capacity_bytes)
    except Exception:
        cap = 64 * 1024 * 1024
    return (cap * 3) // 4


_VMEM_LIMIT = _vmem_limit_bytes()


# ----------------------------- Pallas kernels --------------------------------

def _conv3_kernel(x_ref, *refs, prologue, nout):
    """Conv1d(k=3,s=1,p=1) on one channels-last sequence + per-batch BN stats.

    Optional fused input prologue, applied to the tile right after the load so
    the previous layer's activation never makes an HBM round trip:
      "affine":   x = relu(x * scale + shift)
      "residual": x = relu(x * scale + shift + r)       (identity shortcut add)

    The taps are fused into one MXU dot of depth 3*Cin by shifting x (not the
    conv result) -> no (L, Cout) shifted copies; tap adds live in the MXU
    accumulator.  `nout == 2` splits the output channels into two lane-dense
    HBM arrays (used for the fused block3 conv_a + conv_s call).
    """
    refs = list(refs)
    s_ref = t_ref = r_ref = None
    if prologue != "none":
        s_ref, t_ref = refs.pop(0), refs.pop(0)
    if prologue == "residual":
        r_ref = refs.pop(0)
    w_ref, b_ref = refs.pop(0), refs.pop(0)
    o_refs, stats_ref = tuple(refs[:nout]), refs[nout]

    x = x_ref[0]                                           # (L, Cin)
    if prologue != "none":
        pre = x * s_ref[...] + t_ref[...]
        if prologue == "residual":
            pre = pre + r_ref[0]
        x = jnp.maximum(pre, 0.0)

    L, cin = x.shape
    zero = jnp.zeros((1, cin), x.dtype)
    xm1 = jnp.concatenate([zero, x[:L - 1]], axis=0)       # x[l-1] (zero pad)
    xp1 = jnp.concatenate([x[1:], zero], axis=0)           # x[l+1] (zero pad)

    if cin == 1:
        # Stem: rank-1 taps -> VPU broadcast multiplies (no padded MXU dot).
        # TODO(synk): map L onto the lane axis for the stem to avoid the
        # 128x lane-padded (L, 1) VMEM tile at very large L.
        y = xm1 * w_ref[0:1, :] + x * w_ref[1:2, :] + xp1 * w_ref[2:3, :]
    else:
        x_cat = jnp.concatenate([xm1, x, xp1], axis=-1)    # (L, 3*Cin)
        y = jnp.dot(x_cat, w_ref[...], preferred_element_type=jnp.float32)
    y = y + b_ref[...]

    off = 0
    for o in o_refs:
        c = o.shape[-1]
        o[0] = y if nout == 1 else y[:, off:off + c]       # lane-aligned splits
        off += c

    # Per-batch partial BN statistics (reduced over the batch outside the
    # kernel) -> no cross-step carry, batch grid axis stays 'parallel'.
    stats_ref[0] = jnp.concatenate(
        [jnp.sum(y, axis=0, keepdims=True),
         jnp.sum(y * y, axis=0, keepdims=True)], axis=0)


def _pool_pairs(y, chan, pairs):
    # MaxPool1d(2) over `pairs` adjacent timestep pairs laid out along the row.
    parts = [jnp.maximum(y[:, (2 * i) * chan:(2 * i + 1) * chan],
                         y[:, (2 * i + 1) * chan:(2 * i + 2) * chan])
             for i in range(pairs)]
    return parts[0] if pairs == 1 else jnp.concatenate(parts, axis=-1)


def _affine_pool_kernel(x_ref, s_ref, t_ref, o_ref, *, chan, pairs):
    # relu(x*scale + shift) + MaxPool1d(2), lane-dense output
    y = jnp.maximum(x_ref[...] * s_ref[...] + t_ref[...], 0.0)
    o_ref[...] = _pool_pairs(y, chan, pairs)


def _residual2_pool_kernel(xa_ref, sa_ref, ta_ref, xb_ref, sb_ref, tb_ref,
                           o_ref, *, chan, pairs):
    # relu(xa*sa+ta + xb*sb+tb) + MaxPool1d(2)  (projected shortcut finish)
    y = jnp.maximum(xa_ref[...] * sa_ref[...] + ta_ref[...]
                    + xb_ref[...] * sb_ref[...] + tb_ref[...], 0.0)
    o_ref[...] = _pool_pairs(y, chan, pairs)


# ----------------------------- Pallas wrappers --------------------------------

def conv3_bn_stats(x_nlc, w, b, *, scale=None, shift=None, resid=None,
                   split=None):
    """Conv1d(k=3,s=1,p=1) over channels-last (N, L, Cin) + BN batch stats.

    One sequence per ('parallel') grid step.  Optional fused input
    BN-apply(+identity residual)+ReLU; optional channel split of the output
    into two HBM arrays (fuses block3's conv_a + conv_s into one call).
    Returns (*conv_outputs, stats) with stats of shape (2, Cout_total).
    """
    # TODO(synk): add an L-tiling with a 1-row halo carry for very long
    # sequences (bounds the per-step VMEM footprint on v7x's 64 MiB).
    N, L, Cin = x_nlc.shape
    Ct = w.shape[-1]

    prologue = "none"
    args = [x_nlc]
    in_specs = [pl.BlockSpec((1, L, Cin), lambda n: (n, 0, 0))]
    if scale is not None:
        prologue = "affine"
        args += [scale.reshape(1, Cin), shift.reshape(1, Cin)]
        in_specs += [pl.BlockSpec((1, Cin), lambda n: (0, 0)),
                     pl.BlockSpec((1, Cin), lambda n: (0, 0))]
        if resid is not None:
            prologue = "residual"
            args.append(resid)
            in_specs.append(pl.BlockSpec((1, L, Cin), lambda n: (n, 0, 0)))
    args += [w, b.reshape(1, Ct)]
    in_specs += [pl.BlockSpec((w.shape[0], Ct), lambda n: (0, 0)),
                 pl.BlockSpec((1, Ct), lambda n: (0, 0))]

    couts = (Ct,) if split is None else (split, Ct - split)
    out_shape = [jax.ShapeDtypeStruct((N, L, c), jnp.float32) for c in couts]
    out_specs = [pl.BlockSpec((1, L, c), lambda n: (n, 0, 0)) for c in couts]
    out_shape.append(jax.ShapeDtypeStruct((N, 2, Ct), jnp.float32))
    out_specs.append(pl.BlockSpec((1, 2, Ct), lambda n: (n, 0, 0)))

    res = pl.pallas_call(
        functools.partial(_conv3_kernel, prologue=prologue, nout=len(couts)),
        out_shape=tuple(out_shape),
        grid=(N,),
        in_specs=in_specs,
        out_specs=out_specs,
        compiler_params=pltpu.CompilerParams(
            dimension_semantics=("parallel",),    # per-batch stats -> no carry
            vmem_limit_bytes=_VMEM_LIMIT),
    )(*args)
    *outs, stats_nb = res
    return (*outs, jnp.sum(stats_nb, axis=0))             # tiny batch reduction


def _call_rowwise(kernel, inputs, out_width):
    """Run an elementwise kernel tiled over rows of 2-D slabs.

    Operands with leading dim 1 are per-channel broadcast vectors (resident);
    everything else is tiled (tm, width) over a 'parallel' grid.
    """
    rows = inputs[0].shape[0]
    tm = min(rows, _ROW_TILE)
    grid = (pl.cdiv(rows, tm),)
    in_specs = []
    for a in inputs:
        w = a.shape[1]
        if a.shape[0] == 1:
            in_specs.append(pl.BlockSpec((1, w), lambda i: (0, 0)))
        else:
            in_specs.append(pl.BlockSpec((tm, w), lambda i: (i, 0)))
    return pl.pallas_call(
        kernel,
        out_shape=jax.ShapeDtypeStruct((rows, out_width), jnp.float32),
        grid=grid,
        in_specs=in_specs,
        out_specs=pl.BlockSpec((tm, out_width), lambda i: (i, 0)),
        compiler_params=pltpu.CompilerParams(
            dimension_semantics=("parallel",),
            vmem_limit_bytes=_VMEM_LIMIT),
    )(*inputs)


def _bn_relu_pool(xa, sa, ta, xb=None, sb=None, tb=None):
    """Fused BN-apply (+ optional second BN'ed shortcut) + ReLU + MaxPool1d(2).

    Chooses the timesteps-per-row so the pooled output is lane-dense: C=64
    pools pack 4 timesteps per row (256-wide in, 128-wide out).
    """
    N, L, C = xa.shape
    L2 = (L // 2) * 2                          # MaxPool1d(2) floors odd lengths
    tpr = 4 if (C < 128 and (N * L2) % 4 == 0) else 2
    rows, width = N * L2 // tpr, tpr * C
    pairs, out_w = tpr // 2, tpr * C // 2
    view = lambda z: z[:, :L2, :].reshape(rows, width)     # free reshape
    dup = lambda v: jnp.tile(v.reshape(1, C), (1, tpr))

    if xb is None:
        kernel = functools.partial(_affine_pool_kernel, chan=C, pairs=pairs)
        args = [view(xa), dup(sa), dup(ta)]
    else:
        kernel = functools.partial(_residual2_pool_kernel, chan=C, pairs=pairs)
        args = [view(xa), dup(sa), dup(ta), view(xb), dup(sb), dup(tb)]

    out = _call_rowwise(kernel, args, out_w)
    return out.reshape(N, L2 // 2, C)


def _bn_scale_shift(stats, count, gamma, beta):
    # Fold training-mode BatchNorm (batch stats, biased variance) into a single
    # per-channel scale/shift.  O(C) wrapper work, once per layer.
    # NOTE: E[x^2]-E[x]^2 in fp32 is cancellation-prone for huge N*L; switch to
    # a shifted/two-pass formulation if tolerances ever tighten.
    mean = stats[0] / count
    var = stats[1] / count - mean * mean
    scale = gamma / jnp.sqrt(var + EPS)
    shift = beta - mean * scale
    return scale, shift


# ----------------------------- Model (glue) ----------------------------------

@jax.jit
def rescnn_forward(prep, x_ncl):
    x = jnp.transpose(x_ncl, (0, 2, 1))                   # NCL -> NLC
    n, l, _ = x.shape

    # Stem: conv1 (+ BN stats), then BN+ReLU+MaxPool1d(2) fused, lane-dense.
    y1, st1 = conv3_bn_stats(x, *prep["conv1"])
    s1, t1 = _bn_scale_shift(st1, n * l, *prep["bn1"])
    h1 = _bn_relu_pool(y1, s1, t1)                         # (N, L/2, 64)
    cnt = h1.shape[0] * h1.shape[1]

    # Block2 (identity shortcut).  BN_a+ReLU is fused into conv_b's input load;
    # the block output relu(BN_b(b2)+h1) is never written to HBM -- it is fused
    # into block3's conv input below.
    p2 = prep["block2"]
    a2, sta = conv3_bn_stats(h1, *p2["conv_a"])
    sa, ta = _bn_scale_shift(sta, cnt, *p2["bn_a"])
    b2, stb = conv3_bn_stats(a2, *p2["conv_b"], scale=sa, shift=ta)
    sb2, tb2 = _bn_scale_shift(stb, cnt, *p2["bn_b"])

    # Block3 (projected shortcut).  conv_a and conv_s share their input, so
    # they run as ONE pallas_call with weights concatenated along Cout; the
    # call also applies block2's BN_b + identity add + ReLU to its input tile.
    p3 = prep["block3"]
    ca = p3["bn_a"][0].shape[0]
    a3, c3, st_as = conv3_bn_stats(b2, *p3["conv_as"], scale=sb2, shift=tb2,
                                   resid=h1, split=ca)
    sa3, ta3 = _bn_scale_shift(st_as[:, :ca], cnt, *p3["bn_a"])
    ss3, ts3 = _bn_scale_shift(st_as[:, ca:], cnt, *p3["bn_s"])
    b3, stb3 = conv3_bn_stats(a3, *p3["conv_b"], scale=sa3, shift=ta3)
    sb3, tb3 = _bn_scale_shift(stb3, cnt, *p3["bn_b"])

    # BN_b + BN_s + add + ReLU + final MaxPool1d(2) in one lane-dense pass.
    out = _bn_relu_pool(b3, sb3, tb3, xb=c3, sb=ss3, tb=ts3)
    return jnp.transpose(out, (0, 2, 1))                   # NLC -> NCL


# ----------------------------- Parameters ------------------------------------

def init_params(key):
    keys = jax.random.split(key, 6)

    def conv_init(k, cout, cin, ks=3):
        kw, kb = jax.random.split(k)
        bound = 1.0 / (cin * ks) ** 0.5
        w = jax.random.uniform(kw, (cout, cin, ks), jnp.float32, -bound, bound)
        b = jax.random.uniform(kb, (cout,), jnp.float32, -bound, bound)
        return w, b

    def bn_init(c):  # torch BatchNorm1d defaults: gamma=1, beta=0
        return jnp.ones((c,), jnp.float32), jnp.zeros((c,), jnp.float32)

    return {
        "conv1": conv_init(keys[0], 64, 1),
        "bn1": bn_init(64),
        "block2": {
            "conv_a": conv_init(keys[1], 64, 64), "bn_a": bn_init(64),
            "conv_b": conv_init(keys[2], 64, 64), "bn_b": bn_init(64),
        },
        "block3": {
            "conv_a": conv_init(keys[3], 128, 64), "bn_a": bn_init(128),
            "conv_b": conv_init(keys[4], 128, 128), "bn_b": bn_init(128),
            "conv_s": conv_init(keys[5], 128, 64), "bn_s": bn_init(128),
        },
    }


def prepare_params(params):
    """One-time weight re-layout (hoisted out of the forward pass):
    (Cout, Cin, 3) -> taps stacked along the contraction dim (3*Cin, Cout);
    block3's conv_a / conv_s are concatenated along Cout for the fused call."""
    def conv(wb):
        w, b = wb
        cout, cin, _ = w.shape
        wk = jnp.transpose(w, (2, 1, 0)).reshape(3 * cin, cout)  # [tap0;tap1;tap2]
        return wk, b.reshape(1, -1)

    p2, p3 = params["block2"], params["block3"]
    wa, ba = conv(p3["conv_a"])
    ws, bs = conv(p3["conv_s"])
    return {
        "conv1": conv(params["conv1"]), "bn1": params["bn1"],
        "block2": {"conv_a": conv(p2["conv_a"]), "bn_a": p2["bn_a"],
                   "conv_b": conv(p2["conv_b"]), "bn_b": p2["bn_b"]},
        "block3": {
            "conv_as": (jnp.concatenate([wa, ws], axis=-1),
                        jnp.concatenate([ba, bs], axis=-1)),
            "conv_b": conv(p3["conv_b"]),
            "bn_a": p3["bn_a"], "bn_b": p3["bn_b"], "bn_s": p3["bn_s"],
        },
    }


# ----------------------------- Pure-JAX reference -----------------------------

def _ref_conv(x_ncl, w, b):
    out = jax.lax.conv_general_dilated(
        x_ncl, w, window_strides=(1,), padding=((1, 1),),
        dimension_numbers=("NCH", "OIH", "NCH"))
    return out + b[None, :, None]


def _ref_bn(x_ncl, g, bt, relu=False):
    mean = jnp.mean(x_ncl, axis=(0, 2), keepdims=True)
    var = jnp.mean((x_ncl - mean) ** 2, axis=(0, 2), keepdims=True)
    y = (x_ncl - mean) / jnp.sqrt(var + EPS) * g[None, :, None] + bt[None, :, None]
    return jnp.maximum(y, 0.0) if relu else y


def _ref_pool(x_ncl):
    N, C, L = x_ncl.shape
    Lo = L // 2
    return jnp.max(x_ncl[:, :, : 2 * Lo].reshape(N, C, Lo, 2), axis=-1)


def _ref_block(p, x):
    y = _ref_bn(_ref_conv(x, *p["conv_a"]), *p["bn_a"], relu=True)
    y = _ref_bn(_ref_conv(y, *p["conv_b"]), *p["bn_b"])
    s = _ref_bn(_ref_conv(x, *p["conv_s"]), *p["bn_s"]) if "conv_s" in p else x
    return jnp.maximum(y + s, 0.0)


def ref_forward(params, x_ncl):
    out = _ref_bn(_ref_conv(x_ncl, *params["conv1"]), *params["bn1"], relu=True)
    out = _ref_pool(out)
    out = _ref_block(params["block2"], out)
    out = _ref_block(params["block3"], out)
    out = _ref_pool(out)
    return out


# ----------------------------- Main -------------------------------------------

if __name__ == "__main__":
    key = jax.random.PRNGKey(0)
    pkey, xkey = jax.random.split(key)
    params = init_params(pkey)
    prep = prepare_params(params)

    # x: (N=2, C=1, L=16) in PyTorch NCL layout
    x = jax.random.normal(xkey, (2, 1, 16), jnp.float32)

    out = jax.block_until_ready(rescnn_forward(prep, x))
    ref = jax.block_until_ready(ref_forward(params, x))

    assert out.shape == (2, 128, 4), out.shape
    err = float(jnp.max(jnp.abs(out - ref)))
    assert jnp.allclose(out, ref, rtol=1e-4, atol=1e-4), err

    print("KERNEL_OK")
</pallas_src>

<mosaic_0001>
module attributes {stable_mosaic.version = 11 : i64} {
  func.func @_conv3_kernel(%arg0: i32, %arg1: memref<1x16x1xf32, #tpu.memory_space<vmem>>, %arg2: memref<3x64xf32, #tpu.memory_space<vmem>>, %arg3: memref<1x64xf32, #tpu.memory_space<vmem>>, %arg4: memref<1x16x64xf32, #tpu.memory_space<vmem>>, %arg5: memref<1x2x64xf32, #tpu.memory_space<vmem>>) attributes {dimension_semantics = [#tpu.dimension_semantics<parallel>], iteration_bounds = array<i64: 2>, scalar_prefetch = 0 : i64, scratch_operands = 0 : i64, tpu.core_type = #tpu.core_type<tc>, window_params = [{transform_indices = @transform_0, window_bounds = array<i64: 1, 16, 1>}, {pipeline_mode = #tpu.pipeline_mode<synchronous>, transform_indices = @transform_1, window_bounds = array<i64: 3, 64>}, {pipeline_mode = #tpu.pipeline_mode<synchronous>, transform_indices = @transform_2, window_bounds = array<i64: 1, 64>}, {transform_indices = @transform_3, window_bounds = array<i64: 1, 16, 64>}, {transform_indices = @transform_4, window_bounds = array<i64: 1, 2, 64>}]} {
    %c0 = arith.constant 0 : index
    %c0_0 = arith.constant 0 : index
    %c0_1 = arith.constant 0 : index
    %0 = vector.load %arg1[%c0, %c0_0, %c0_1] : memref<1x16x1xf32, #tpu.memory_space<vmem>>, vector<1x16x1xf32>
    %1 = vector.shape_cast %0 : vector<1x16x1xf32> to vector<16x1xf32>
    %cst = arith.constant 0.000000e+00 : f32
    %2 = vector.broadcast %cst : f32 to vector<1x1xf32>
    %3 = vector.extract_strided_slice %1 {offsets = [0, 0], sizes = [15, 1], strides = [1, 1]} : vector<16x1xf32> to vector<15x1xf32>
    %4 = tpu.concatenate %2, %3 in 0 : vector<1x1xf32>, vector<15x1xf32> -> vector<16x1xf32>
    %5 = vector.extract_strided_slice %1 {offsets = [1, 0], sizes = [15, 1], strides = [1, 1]} : vector<16x1xf32> to vector<15x1xf32>
    %6 = tpu.concatenate %5, %2 in 0 : vector<15x1xf32>, vector<1x1xf32> -> vector<16x1xf32>
    %c0_2 = arith.constant 0 : index
    %c0_3 = arith.constant 0 : index
    %7 = vector.load %arg2[%c0_2, %c0_3] : memref<3x64xf32, #tpu.memory_space<vmem>>, vector<1x64xf32>
    %8 = vector.broadcast %4 : vector<16x1xf32> to vector<16x64xf32>
    %9 = vector.broadcast %7 : vector<1x64xf32> to vector<16x64xf32>
    %10 = arith.mulf %8, %9 : vector<16x64xf32>
    %c1 = arith.constant 1 : index
    %c0_4 = arith.constant 0 : index
    %11 = vector.load %arg2[%c1, %c0_4] : memref<3x64xf32, #tpu.memory_space<vmem>>, vector<1x64xf32>
    %12 = vector.broadcast %1 : vector<16x1xf32> to vector<16x64xf32>
    %13 = vector.broadcast %11 : vector<1x64xf32> to vector<16x64xf32>
    %14 = arith.mulf %12, %13 : vector<16x64xf32>
    %15 = arith.addf %10, %14 : vector<16x64xf32>
    %c2 = arith.constant 2 : index
    %c0_5 = arith.constant 0 : index
    %16 = vector.load %arg2[%c2, %c0_5] : memref<3x64xf32, #tpu.memory_space<vmem>>, vector<1x64xf32>
    %17 = vector.broadcast %6 : vector<16x1xf32> to vector<16x64xf32>
    %18 = vector.broadcast %16 : vector<1x64xf32> to vector<16x64xf32>
    %19 = arith.mulf %17, %18 : vector<16x64xf32>
    %20 = arith.addf %15, %19 : vector<16x64xf32>
    %c0_6 = arith.constant 0 : index
    %c0_7 = arith.constant 0 : index
    %21 = vector.load %arg3[%c0_6, %c0_7] : memref<1x64xf32, #tpu.memory_space<vmem>>, vector<1x64xf32>
    %22 = vector.broadcast %21 : vector<1x64xf32> to vector<16x64xf32>
    %23 = arith.addf %20, %22 : vector<16x64xf32>
    %c0_8 = arith.constant 0 : index
    %c0_9 = arith.constant 0 : index
    %c0_10 = arith.constant 0 : index
    %24 = vector.load %arg4[%c0_8, %c0_9, %c0_10] : memref<1x16x64xf32, #tpu.memory_space<vmem>>, vector<1x16x64xf32>
    %25 = vector.shape_cast %24 : vector<1x16x64xf32> to vector<16x64xf32>
    %26 = vector.shape_cast %23 : vector<16x64xf32> to vector<1x16x64xf32>
    tpu.vector_store %arg4[%c0_8, %c0_9, %c0_10], %26 {strides = array<i32>} : memref<1x16x64xf32, #tpu.memory_space<vmem>>, vector<1x16x64xf32>,
    %cst_11 = arith.constant dense<0.000000e+00> : vector<64xf32>
    %27 = vector.multi_reduction <add>, %23, %cst_11 [0] : vector<16x64xf32> to vector<64xf32>
    %28 = vector.shape_cast %27 : vector<64xf32> to vector<1x64xf32>
    %29 = arith.mulf %23, %23 : vector<16x64xf32>
    %cst_12 = arith.constant dense<0.000000e+00> : vector<64xf32>
    %30 = vector.multi_reduction <add>, %29, %cst_12 [0] : vector<16x64xf32> to vector<64xf32>
    %31 = vector.shape_cast %30 : vector<64xf32> to vector<1x64xf32>
    %32 = tpu.concatenate %28, %31 in 0 : vector<1x64xf32>, vector<1x64xf32> -> vector<2x64xf32>
    %c0_13 = arith.constant 0 : index
    %c0_14 = arith.constant 0 : index
    %c0_15 = arith.constant 0 : index
    %33 = vector.load %arg5[%c0_13, %c0_14, %c0_15] : memref<1x2x64xf32, #tpu.memory_space<vmem>>, vector<1x2x64xf32>
    %34 = vector.shape_cast %33 : vector<1x2x64xf32> to vector<2x64xf32>
    %35 = vector.shape_cast %32 : vector<2x64xf32> to vector<1x2x64xf32>
    tpu.vector_store %arg5[%c0_13, %c0_14, %c0_15], %35 {strides = array<i32>} : memref<1x2x64xf32, #tpu.memory_space<vmem>>, vector<1x2x64xf32>,
    return
  }
  func.func @transform_0(%arg0: i32) -> (i32, i32, i32) {
    %c0_i32 = arith.constant 0 : i32
    %c0_i32_0 = arith.constant 0 : i32
    %c0_i32_1 = arith.constant 0 : i32
    return %arg0, %c0_i32, %c0_i32_0 : i32, i32, i32
  }
  func.func @transform_1(%arg0: i32) -> (i32, i32) {
    %c0_i32 = arith.constant 0 : i32
    %c0_i32_0 = arith.constant 0 : i32
    %c0_i32_1 = arith.constant 0 : i32
    return %c0_i32, %c0_i32_0 : i32, i32
  }
  func.func @transform_2(%arg0: i32) -> (i32, i32) {
    %c0_i32 = arith.constant 0 : i32
    %c0_i32_0 = arith.constant 0 : i32
    %c0_i32_1 = arith.constant 0 : i32
    return %c0_i32, %c0_i32_0 : i32, i32
  }
  func.func @transform_3(%arg0: i32) -> (i32, i32, i32) {
    %c0_i32 = arith.constant 0 : i32
    %c0_i32_0 = arith.constant 0 : i32
    %c0_i32_1 = arith.constant 0 : i32
    return %arg0, %c0_i32, %c0_i32_0 : i32, i32, i32
  }
  func.func @transform_4(%arg0: i32) -> (i32, i32, i32) {
    %c0_i32 = arith.constant 0 : i32
    %c0_i32_0 = arith.constant 0 : i32
    %c0_i32_1 = arith.constant 0 : i32
    return %arg0, %c0_i32, %c0_i32_0 : i32, i32, i32
  }
}

module attributes {stable_mosaic.version = 11 : i64} {
  func.func @_affine_pool_kernel(%arg0: i32, %arg1: memref<8x256xf32, #tpu.memory_space<vmem>>, %arg2: memref<1x256xf32, #tpu.memory_space<vmem>>, %arg3: memref<1x256xf32, #tpu.memory_space<vmem>>, %arg4: memref<8x128xf32, #tpu.memory_space<vmem>>) attributes {dimension_semantics = [#tpu.dimension_semantics<parallel>], iteration_bounds = array<i64: 1>, scalar_prefetch = 0 : i64, scratch_operands = 0 : i64, tpu.core_type = #tpu.core_type<tc>, window_params = [{transform_indices = @transform_0, window_bounds = array<i64: 8, 256>}, {pipeline_mode = #tpu.pipeline_mode<synchronous>, transform_indices = @transform_1, window_bounds = array<i64: 1, 256>}, {pipeline_mode = #tpu.pipeline_mode<synchronous>, transform_indices = @transform_2, window_bounds = array<i64: 1, 256>}, {transform_indices = @transform_3, window_bounds = array<i64: 8, 128>}]} {
    %c0 = arith.constant 0 : index
    %c0_0 = arith.constant 0 : index
    %0 = vector.load %arg1[%c0, %c0_0] : memref<8x256xf32, #tpu.memory_space<vmem>>, vector<8x256xf32>
    %c0_1 = arith.constant 0 : index
    %c0_2 = arith.constant 0 : index
    %1 = vector.load %arg2[%c0_1, %c0_2] : memref<1x256xf32, #tpu.memory_space<vmem>>, vector<1x256xf32>
    %2 = vector.broadcast %1 : vector<1x256xf32> to vector<8x256xf32>
    %3 = arith.mulf %0, %2 : vector<8x256xf32>
    %c0_3 = arith.constant 0 : index
    %c0_4 = arith.constant 0 : index
    %4 = vector.load %arg3[%c0_3, %c0_4] : memref<1x256xf32, #tpu.memory_space<vmem>>, vector<1x256xf32>
    %5 = vector.broadcast %4 : vector<1x256xf32> to vector<8x256xf32>
    %6 = arith.addf %3, %5 : vector<8x256xf32>
    %cst = arith.constant 0.000000e+00 : f32
    %7 = vector.broadcast %cst : f32 to vector<8x256xf32>
    %8 = arith.maximumf %6, %7 : vector<8x256xf32>
    %9 = vector.extract_strided_slice %8 {offsets = [0, 0], sizes = [8, 64], strides = [1, 1]} : vector<8x256xf32> to vector<8x64xf32>
    %10 = vector.extract_strided_slice %8 {offsets = [0, 64], sizes = [8, 64], strides = [1, 1]} : vector<8x256xf32> to vector<8x64xf32>
    %11 = arith.maximumf %9, %10 : vector<8x64xf32>
    %12 = vector.extract_strided_slice %8 {offsets = [0, 128], sizes = [8, 64], strides = [1, 1]} : vector<8x256xf32> to vector<8x64xf32>
    %13 = vector.extract_strided_slice %8 {offsets = [0, 192], sizes = [8, 64], strides = [1, 1]} : vector<8x256xf32> to vector<8x64xf32>
    %14 = arith.maximumf %12, %13 : vector<8x64xf32>
    %15 = tpu.concatenate %11, %14 in 1 : vector<8x64xf32>, vector<8x64xf32> -> vector<8x128xf32>
    %c0_5 = arith.constant 0 : index
    %c0_6 = arith.constant 0 : index
    %16 = vector.load %arg4[%c0_5, %c0_6] : memref<8x128xf32, #tpu.memory_space<vmem>>, vector<8x128xf32>
    tpu.vector_store %arg4[%c0_5, %c0_6], %15 {strides = array<i32>} : memref<8x128xf32, #tpu.memory_space<vmem>>, vector<8x128xf32>,
    return
  }
  func.func @transform_0(%arg0: i32) -> (i32, i32) {
    %c0_i32 = arith.constant 0 : i32
    %c0_i32_0 = arith.constant 0 : i32
    return %arg0, %c0_i32 : i32, i32
  }
  func.func @transform_1(%arg0: i32) -> (i32, i32) {
    %c0_i32 = arith.constant 0 : i32
    %c0_i32_0 = arith.constant 0 : i32
    %c0_i32_1 = arith.constant 0 : i32
    return %c0_i32, %c0_i32_0 : i32, i32
  }
  func.func @transform_2(%arg0: i32) -> (i32, i32) {
    %c0_i32 = arith.constant 0 : i32
    %c0_i32_0 = arith.constant 0 : i32
    %c0_i32_1 = arith.constant 0 : i32
    return %c0_i32, %c0_i32_0 : i32, i32
  }
  func.func @transform_3(%arg0: i32) -> (i32, i32) {
    %c0_i32 = arith.constant 0 : i32
    %c0_i32_0 = arith.constant 0 : i32
    return %arg0, %c0_i32 : i32, i32
  }
}

module attributes {stable_mosaic.version = 11 : i64} {
  func.func @_conv3_kernel(%arg0: i32, %arg1: memref<1x8x64xf32, #tpu.memory_space<vmem>>, %arg2: memref<192x64xf32, #tpu.memory_space<vmem>>, %arg3: memref<1x64xf32, #tpu.memory_space<vmem>>, %arg4: memref<1x8x64xf32, #tpu.memory_space<vmem>>, %arg5: memref<1x2x64xf32, #tpu.memory_space<vmem>>) attributes {dimension_semantics = [#tpu.dimension_semantics<parallel>], iteration_bounds = array<i64: 2>, scalar_prefetch = 0 : i64, scratch_operands = 0 : i64, tpu.core_type = #tpu.core_type<tc>, window_params = [{transform_indices = @transform_0, window_bounds = array<i64: 1, 8, 64>}, {pipeline_mode = #tpu.pipeline_mode<synchronous>, transform_indices = @transform_1, window_bounds = array<i64: 192, 64>}, {pipeline_mode = #tpu.pipeline_mode<synchronous>, transform_indices = @transform_2, window_bounds = array<i64: 1, 64>}, {transform_indices = @transform_3, window_bounds = array<i64: 1, 8, 64>}, {transform_indices = @transform_4, window_bounds = array<i64: 1, 2, 64>}]} {
    %c0 = arith.constant 0 : index
    %c0_0 = arith.constant 0 : index
    %c0_1 = arith.constant 0 : index
    %0 = vector.load %arg1[%c0, %c0_0, %c0_1] : memref<1x8x64xf32, #tpu.memory_space<vmem>>, vector<1x8x64xf32>
    %1 = vector.shape_cast %0 : vector<1x8x64xf32> to vector<8x64xf32>
    %cst = arith.constant 0.000000e+00 : f32
    %2 = vector.broadcast %cst : f32 to vector<1x64xf32>
    %3 = vector.extract_strided_slice %1 {offsets = [0, 0], sizes = [7, 64], strides = [1, 1]} : vector<8x64xf32> to vector<7x64xf32>
    %4 = tpu.concatenate %2, %3 in 0 : vector<1x64xf32>, vector<7x64xf32> -> vector<8x64xf32>
    %5 = vector.extract_strided_slice %1 {offsets = [1, 0], sizes = [7, 64], strides = [1, 1]} : vector<8x64xf32> to vector<7x64xf32>
    %6 = tpu.concatenate %5, %2 in 0 : vector<7x64xf32>, vector<1x64xf32> -> vector<8x64xf32>
    %7 = tpu.concatenate %4, %1, %6 in 1 : vector<8x64xf32>, vector<8x64xf32>, vector<8x64xf32> -> vector<8x192xf32>
    %c0_2 = arith.constant 0 : index
    %c0_3 = arith.constant 0 : index
    %8 = vector.load %arg2[%c0_2, %c0_3] : memref<192x64xf32, #tpu.memory_space<vmem>>, vector<192x64xf32>
    %cst_4 = arith.constant dense<0.000000e+00> : vector<8x64xf32>
    %9 = tpu.matmul %7, %8, %cst_4 {dimension_numbers = #tpu.dot_dimension_numbers<[1], [0], [0], [1], [0, 0, 1, 1], [], []>} : vector<8x192xf32>, vector<192x64xf32>, vector<8x64xf32> -> vector<8x64xf32>
    %c0_5 = arith.constant 0 : index
    %c0_6 = arith.constant 0 : index
    %10 = vector.load %arg3[%c0_5, %c0_6] : memref<1x64xf32, #tpu.memory_space<vmem>>, vector<1x64xf32>
    %11 = vector.broadcast %10 : vector<1x64xf32> to vector<8x64xf32>
    %12 = arith.addf %9, %11 : vector<8x64xf32>
    %c0_7 = arith.constant 0 : index
    %c0_8 = arith.constant 0 : index
    %c0_9 = arith.constant 0 : index
    %13 = vector.load %arg4[%c0_7, %c0_8, %c0_9] : memref<1x8x64xf32, #tpu.memory_space<vmem>>, vector<1x8x64xf32>
    %14 = vector.shape_cast %13 : vector<1x8x64xf32> to vector<8x64xf32>
    %15 = vector.shape_cast %12 : vector<8x64xf32> to vector<1x8x64xf32>
    tpu.vector_store %arg4[%c0_7, %c0_8, %c0_9], %15 {strides = array<i32>} : memref<1x8x64xf32, #tpu.memory_space<vmem>>, vector<1x8x64xf32>,
    %cst_10 = arith.constant dense<0.000000e+00> : vector<64xf32>
    %16 = vector.multi_reduction <add>, %12, %cst_10 [0] : vector<8x64xf32> to vector<64xf32>
    %17 = vector.shape_cast %16 : vector<64xf32> to vector<1x64xf32>
    %18 = arith.mulf %12, %12 : vector<8x64xf32>
    %cst_11 = arith.constant dense<0.000000e+00> : vector<64xf32>
    %19 = vector.multi_reduction <add>, %18, %cst_11 [0] : vector<8x64xf32> to vector<64xf32>
    %20 = vector.shape_cast %19 : vector<64xf32> to vector<1x64xf32>
    %21 = tpu.concatenate %17, %20 in 0 : vector<1x64xf32>, vector<1x64xf32> -> vector<2x64xf32>
    %c0_12 = arith.constant 0 : index
    %c0_13 = arith.constant 0 : index
    %c0_14 = arith.constant 0 : index
    %22 = vector.load %arg5[%c0_12, %c0_13, %c0_14] : memref<1x2x64xf32, #tpu.memory_space<vmem>>, vector<1x2x64xf32>
    %23 = vector.shape_cast %22 : vector<1x2x64xf32> to vector<2x64xf32>
    %24 = vector.shape_cast %21 : vector<2x64xf32> to vector<1x2x64xf32>
    tpu.vector_store %arg5[%c0_12, %c0_13, %c0_14], %24 {strides = array<i32>} : memref<1x2x64xf32, #tpu.memory_space<vmem>>, vector<1x2x64xf32>,
    return
  }
  func.func @transform_0(%arg0: i32) -> (i32, i32, i32) {
    %c0_i32 = arith.constant 0 : i32
    %c0_i32_0 = arith.constant 0 : i32
    %c0_i32_1 = arith.constant 0 : i32
    return %arg0, %c0_i32, %c0_i32_0 : i32, i32, i32
  }
  func.func @transform_1(%arg0: i32) -> (i32, i32) {
    %c0_i32 = arith.constant 0 : i32
    %c0_i32_0 = arith.constant 0 : i32
    %c0_i32_1 = arith.constant 0 : i32
    return %c0_i32, %c0_i32_0 : i32, i32
  }
  func.func @transform_2(%arg0: i32) -> (i32, i32) {
    %c0_i32 = arith.constant 0 : i32
    %c0_i32_0 = arith.constant 0 : i32
    %c0_i32_1 = arith.constant 0 : i32
    return %c0_i32, %c0_i32_0 : i32, i32
  }
  func.func @transform_3(%arg0: i32) -> (i32, i32, i32) {
    %c0_i32 = arith.constant 0 : i32
    %c0_i32_0 = arith.constant 0 : i32
    %c0_i32_1 = arith.constant 0 : i32
    return %arg0, %c0_i32, %c0_i32_0 : i32, i32, i32
  }
  func.func @transform_4(%arg0: i32) -> (i32, i32, i32) {
    %c0_i32 = arith.constant 0 : i32
    %c0_i32_0 = arith.constant 0 : i32
    %c0_i32_1 = arith.constant 0 : i32
    return %arg0, %c0_i32, %c0_i32_0 : i32, i32, i32
  }
}

module attributes {stable_mosaic.version = 11 : i64} {
  func.func @_conv3_kernel(%arg0: i32, %arg1: memref<1x8x64xf32, #tpu.memory_space<vmem>>, %arg2: memref<1x64xf32, #tpu.memory_space<vmem>>, %arg3: memref<1x64xf32, #tpu.memory_space<vmem>>, %arg4: memref<192x64xf32, #tpu.memory_space<vmem>>, %arg5: memref<1x64xf32, #tpu.memory_space<vmem>>, %arg6: memref<1x8x64xf32, #tpu.memory_space<vmem>>, %arg7: memref<1x2x64xf32, #tpu.memory_space<vmem>>) attributes {dimension_semantics = [#tpu.dimension_semantics<parallel>], iteration_bounds = array<i64: 2>, scalar_prefetch = 0 : i64, scratch_operands = 0 : i64, tpu.core_type = #tpu.core_type<tc>, window_params = [{transform_indices = @transform_0, window_bounds = array<i64: 1, 8, 64>}, {pipeline_mode = #tpu.pipeline_mode<synchronous>, transform_indices = @transform_1, window_bounds = array<i64: 1, 64>}, {pipeline_mode = #tpu.pipeline_mode<synchronous>, transform_indices = @transform_2, window_bounds = array<i64: 1, 64>}, {pipeline_mode = #tpu.pipeline_mode<synchronous>, transform_indices = @transform_3, window_bounds = array<i64: 192, 64>}, {pipeline_mode = #tpu.pipeline_mode<synchronous>, transform_indices = @transform_4, window_bounds = array<i64: 1, 64>}, {transform_indices = @transform_5, window_bounds = array<i64: 1, 8, 64>}, {transform_indices = @transform_6, window_bounds = array<i64: 1, 2, 64>}]} {
    %c0 = arith.constant 0 : index
    %c0_0 = arith.constant 0 : index
    %c0_1 = arith.constant 0 : index
    %0 = vector.load %arg1[%c0, %c0_0, %c0_1] : memref<1x8x64xf32, #tpu.memory_space<vmem>>, vector<1x8x64xf32>
    %1 = vector.shape_cast %0 : vector<1x8x64xf32> to vector<8x64xf32>
    %c0_2 = arith.constant 0 : index
    %c0_3 = arith.constant 0 : index
    %2 = vector.load %arg2[%c0_2, %c0_3] : memref<1x64xf32, #tpu.memory_space<vmem>>, vector<1x64xf32>
    %3 = vector.broadcast %2 : vector<1x64xf32> to vector<8x64xf32>
    %4 = arith.mulf %1, %3 : vector<8x64xf32>
    %c0_4 = arith.constant 0 : index
    %c0_5 = arith.constant 0 : index
    %5 = vector.load %arg3[%c0_4, %c0_5] : memref<1x64xf32, #tpu.memory_space<vmem>>, vector<1x64xf32>
    %6 = vector.broadcast %5 : vector<1x64xf32> to vector<8x64xf32>
    %7 = arith.addf %4, %6 : vector<8x64xf32>
    %cst = arith.constant 0.000000e+00 : f32
    %8 = vector.broadcast %cst : f32 to vector<8x64xf32>
    %9 = arith.maximumf %7, %8 : vector<8x64xf32>
    %cst_6 = arith.constant 0.000000e+00 : f32
    %10 = vector.broadcast %cst_6 : f32 to vector<1x64xf32>
    %11 = vector.extract_strided_slice %9 {offsets = [0, 0], sizes = [7, 64], strides = [1, 1]} : vector<8x64xf32> to vector<7x64xf32>
    %12 = tpu.concatenate %10, %11 in 0 : vector<1x64xf32>, vector<7x64xf32> -> vector<8x64xf32>
    %13 = vector.extract_strided_slice %9 {offsets = [1, 0], sizes = [7, 64], strides = [1, 1]} : vector<8x64xf32> to vector<7x64xf32>
    %14 = tpu.concatenate %13, %10 in 0 : vector<7x64xf32>, vector<1x64xf32> -> vector<8x64xf32>
    %15 = tpu.concatenate %12, %9, %14 in 1 : vector<8x64xf32>, vector<8x64xf32>, vector<8x64xf32> -> vector<8x192xf32>
    %c0_7 = arith.constant 0 : index
    %c0_8 = arith.constant 0 : index
    %16 = vector.load %arg4[%c0_7, %c0_8] : memref<192x64xf32, #tpu.memory_space<vmem>>, vector<192x64xf32>
    %cst_9 = arith.constant dense<0.000000e+00> : vector<8x64xf32>
    %17 = tpu.matmul %15, %16, %cst_9 {dimension_numbers = #tpu.dot_dimension_numbers<[1], [0], [0], [1], [0, 0, 1, 1], [], []>} : vector<8x192xf32>, vector<192x64xf32>, vector<8x64xf32> -> vector<8x64xf32>
    %c0_10 = arith.constant 0 : index
    %c0_11 = arith.constant 0 : index
    %18 = vector.load %arg5[%c0_10, %c0_11] : memref<1x64xf32, #tpu.memory_space<vmem>>, vector<1x64xf32>
    %19 = vector.broadcast %18 : vector<1x64xf32> to vector<8x64xf32>
    %20 = arith.addf %17, %19 : vector<8x64xf32>
    %c0_12 = arith.constant 0 : index
    %c0_13 = arith.constant 0 : index
    %c0_14 = arith.constant 0 : index
    %21 = vector.load %arg6[%c0_12, %c0_13, %c0_14] : memref<1x8x64xf32, #tpu.memory_space<vmem>>, vector<1x8x64xf32>
    %22 = vector.shape_cast %21 : vector<1x8x64xf32> to vector<8x64xf32>
    %23 = vector.shape_cast %20 : vector<8x64xf32> to vector<1x8x64xf32>
    tpu.vector_store %arg6[%c0_12, %c0_13, %c0_14], %23 {strides = array<i32>} : memref<1x8x64xf32, #tpu.memory_space<vmem>>, vector<1x8x64xf32>,
    %cst_15 = arith.constant dense<0.000000e+00> : vector<64xf32>
    %24 = vector.multi_reduction <add>, %20, %cst_15 [0] : vector<8x64xf32> to vector<64xf32>
    %25 = vector.shape_cast %24 : vector<64xf32> to vector<1x64xf32>
    %26 = arith.mulf %20, %20 : vector<8x64xf32>
    %cst_16 = arith.constant dense<0.000000e+00> : vector<64xf32>
    %27 = vector.multi_reduction <add>, %26, %cst_16 [0] : vector<8x64xf32> to vector<64xf32>
    %28 = vector.shape_cast %27 : vector<64xf32> to vector<1x64xf32>
    %29 = tpu.concatenate %25, %28 in 0 : vector<1x64xf32>, vector<1x64xf32> -> vector<2x64xf32>
    %c0_17 = arith.constant 0 : index
    %c0_18 = arith.constant 0 : index
    %c0_19 = arith.constant 0 : index
    %30 = vector.load %arg7[%c0_17, %c0_18, %c0_19] : memref<1x2x64xf32, #tpu.memory_space<vmem>>, vector<1x2x64xf32>
    %31 = vector.shape_cast %30 : vector<1x2x64xf32> to vector<2x64xf32>
    %32 = vector.shape_cast %29 : vector<2x64xf32> to vector<1x2x64xf32>
    tpu.vector_store %arg7[%c0_17, %c0_18, %c0_19], %32 {strides = array<i32>} : memref<1x2x64xf32, #tpu.memory_space<vmem>>, vector<1x2x64xf32>,
    return
  }
  func.func @transform_0(%arg0: i32) -> (i32, i32, i32) {
    %c0_i32 = arith.constant 0 : i32
    %c0_i32_0 = arith.constant 0 : i32
    %c0_i32_1 = arith.constant 0 : i32
    return %arg0, %c0_i32, %c0_i32_0 : i32, i32, i32
  }
  func.func @transform_1(%arg0: i32) -> (i32, i32) {
    %c0_i32 = arith.constant 0 : i32
    %c0_i32_0 = arith.constant 0 : i32
    %c0_i32_1 = arith.constant 0 : i32
    return %c0_i32, %c0_i32_0 : i32, i32
  }
  func.func @transform_2(%arg0: i32) -> (i32, i32) {
    %c0_i32 = arith.constant 0 : i32
    %c0_i32_0 = arith.constant 0 : i32
    %c0_i32_1 = arith.constant 0 : i32
    return %c0_i32, %c0_i32_0 : i32, i32
  }
  func.func @transform_3(%arg0: i32) -> (i32, i32) {
    %c0_i32 = arith.constant 0 : i32
    %c0_i32_0 = arith.constant 0 : i32
    %c0_i32_1 = arith.constant 0 : i32
    return %c0_i32, %c0_i32_0 : i32, i32
  }
  func.func @transform_4(%arg0: i32) -> (i32, i32) {
    %c0_i32 = arith.constant 0 : i32
    %c0_i32_0 = arith.constant 0 : i32
    %c0_i32_1 = arith.constant 0 : i32
    return %c0_i32, %c0_i32_0 : i32, i32
  }
  func.func @transform_5(%arg0: i32) -> (i32, i32, i32) {
    %c0_i32 = arith.constant 0 : i32
    %c0_i32_0 = arith.constant 0 : i32
    %c0_i32_1 = arith.constant 0 : i32
    return %arg0, %c0_i32, %c0_i32_0 : i32, i32, i32
  }
  func.func @transform_6(%arg0: i32) -> (i32, i32, i32) {
    %c0_i32 = arith.constant 0 : i32
    %c0_i32_0 = arith.constant 0 : i32
    %c0_i32_1 = arith.constant 0 : i32
    return %arg0, %c0_i32, %c0_i32_0 : i32, i32, i32
  }
}

module attributes {stable_mosaic.version = 11 : i64} {
  func.func @_conv3_kernel(%arg0: i32, %arg1: memref<1x8x64xf32, #tpu.memory_space<vmem>>, %arg2: memref<1x64xf32, #tpu.memory_space<vmem>>, %arg3: memref<1x64xf32, #tpu.memory_space<vmem>>, %arg4: memref<1x8x64xf32, #tpu.memory_space<vmem>>, %arg5: memref<192x256xf32, #tpu.memory_space<vmem>>, %arg6: memref<1x256xf32, #tpu.memory_space<vmem>>, %arg7: memref<1x8x128xf32, #tpu.memory_space<vmem>>, %arg8: memref<1x8x128xf32, #tpu.memory_space<vmem>>, %arg9: memref<1x2x256xf32, #tpu.memory_space<vmem>>) attributes {dimension_semantics = [#tpu.dimension_semantics<parallel>], iteration_bounds = array<i64: 2>, scalar_prefetch = 0 : i64, scratch_operands = 0 : i64, tpu.core_type = #tpu.core_type<tc>, window_params = [{transform_indices = @transform_0, window_bounds = array<i64: 1, 8, 64>}, {pipeline_mode = #tpu.pipeline_mode<synchronous>, transform_indices = @transform_1, window_bounds = array<i64: 1, 64>}, {pipeline_mode = #tpu.pipeline_mode<synchronous>, transform_indices = @transform_2, window_bounds = array<i64: 1, 64>}, {transform_indices = @transform_3, window_bounds = array<i64: 1, 8, 64>}, {pipeline_mode = #tpu.pipeline_mode<synchronous>, transform_indices = @transform_4, window_bounds = array<i64: 192, 256>}, {pipeline_mode = #tpu.pipeline_mode<synchronous>, transform_indices = @transform_5, window_bounds = array<i64: 1, 256>}, {transform_indices = @transform_6, window_bounds = array<i64: 1, 8, 128>}, {transform_indices = @transform_7, window_bounds = array<i64: 1, 8, 128>}, {transform_indices = @transform_8, window_bounds = array<i64: 1, 2, 256>}]} {
    %c0 = arith.constant 0 : index
    %c0_0 = arith.constant 0 : index
    %c0_1 = arith.constant 0 : index
    %0 = vector.load %arg1[%c0, %c0_0, %c0_1] : memref<1x8x64xf32, #tpu.memory_space<vmem>>, vector<1x8x64xf32>
    %1 = vector.shape_cast %0 : vector<1x8x64xf32> to vector<8x64xf32>
    %c0_2 = arith.constant 0 : index
    %c0_3 = arith.constant 0 : index
    %2 = vector.load %arg2[%c0_2, %c0_3] : memref<1x64xf32, #tpu.memory_space<vmem>>, vector<1x64xf32>
    %3 = vector.broadcast %2 : vector<1x64xf32> to vector<8x64xf32>
    %4 = arith.mulf %1, %3 : vector<8x64xf32>
    %c0_4 = arith.constant 0 : index
    %c0_5 = arith.constant 0 : index
    %5 = vector.load %arg3[%c0_4, %c0_5] : memref<1x64xf32, #tpu.memory_space<vmem>>, vector<1x64xf32>
    %6 = vector.broadcast %5 : vector<1x64xf32> to vector<8x64xf32>
    %7 = arith.addf %4, %6 : vector<8x64xf32>
    %c0_6 = arith.constant 0 : index
    %c0_7 = arith.constant 0 : index
    %c0_8 = arith.constant 0 : index
    %8 = vector.load %arg4[%c0_6, %c0_7, %c0_8] : memref<1x8x64xf32, #tpu.memory_space<vmem>>, vector<1x8x64xf32>
    %9 = vector.shape_cast %8 : vector<1x8x64xf32> to vector<8x64xf32>
    %10 = arith.addf %7, %9 : vector<8x64xf32>
    %cst = arith.constant 0.000000e+00 : f32
    %11 = vector.broadcast %cst : f32 to vector<8x64xf32>
    %12 = arith.maximumf %10, %11 : vector<8x64xf32>
    %cst_9 = arith.constant 0.000000e+00 : f32
    %13 = vector.broadcast %cst_9 : f32 to vector<1x64xf32>
    %14 = vector.extract_strided_slice %12 {offsets = [0, 0], sizes = [7, 64], strides = [1, 1]} : vector<8x64xf32> to vector<7x64xf32>
    %15 = tpu.concatenate %13, %14 in 0 : vector<1x64xf32>, vector<7x64xf32> -> vector<8x64xf32>
    %16 = vector.extract_strided_slice %12 {offsets = [1, 0], sizes = [7, 64], strides = [1, 1]} : vector<8x64xf32> to vector<7x64xf32>
    %17 = tpu.concatenate %16, %13 in 0 : vector<7x64xf32>, vector<1x64xf32> -> vector<8x64xf32>
    %18 = tpu.concatenate %15, %12, %17 in 1 : vector<8x64xf32>, vector<8x64xf32>, vector<8x64xf32> -> vector<8x192xf32>
    %c0_10 = arith.constant 0 : index
    %c0_11 = arith.constant 0 : index
    %19 = vector.load %arg5[%c0_10, %c0_11] : memref<192x256xf32, #tpu.memory_space<vmem>>, vector<192x256xf32>
    %cst_12 = arith.constant dense<0.000000e+00> : vector<8x256xf32>
    %20 = tpu.matmul %18, %19, %cst_12 {dimension_numbers = #tpu.dot_dimension_numbers<[1], [0], [0], [1], [0, 0, 1, 1], [], []>} : vector<8x192xf32>, vector<192x256xf32>, vector<8x256xf32> -> vector<8x256xf32>
    %c0_13 = arith.constant 0 : index
    %c0_14 = arith.constant 0 : index
    %21 = vector.load %arg6[%c0_13, %c0_14] : memref<1x256xf32, #tpu.memory_space<vmem>>, vector<1x256xf32>
    %22 = vector.broadcast %21 : vector<1x256xf32> to vector<8x256xf32>
    %23 = arith.addf %20, %22 : vector<8x256xf32>
    %24 = vector.extract_strided_slice %23 {offsets = [0, 0], sizes = [8, 128], strides = [1, 1]} : vector<8x256xf32> to vector<8x128xf32>
    %c0_15 = arith.constant 0 : index
    %c0_16 = arith.constant 0 : index
    %c0_17 = arith.constant 0 : index
    %25 = vector.load %arg7[%c0_15, %c0_16, %c0_17] : memref<1x8x128xf32, #tpu.memory_space<vmem>>, vector<1x8x128xf32>
    %26 = vector.shape_cast %25 : vector<1x8x128xf32> to vector<8x128xf32>
    %27 = vector.shape_cast %24 : vector<8x128xf32> to vector<1x8x128xf32>
    tpu.vector_store %arg7[%c0_15, %c0_16, %c0_17], %27 {strides = array<i32>} : memref<1x8x128xf32, #tpu.memory_space<vmem>>, vector<1x8x128xf32>,
    %28 = vector.extract_strided_slice %23 {offsets = [0, 128], sizes = [8, 128], strides = [1, 1]} : vector<8x256xf32> to vector<8x128xf32>
    %c0_18 = arith.constant 0 : index
    %c0_19 = arith.constant 0 : index
    %c0_20 = arith.constant 0 : index
    %29 = vector.load %arg8[%c0_18, %c0_19, %c0_20] : memref<1x8x128xf32, #tpu.memory_space<vmem>>, vector<1x8x128xf32>
    %30 = vector.shape_cast %29 : vector<1x8x128xf32> to vector<8x128xf32>
    %31 = vector.shape_cast %28 : vector<8x128xf32> to vector<1x8x128xf32>
    tpu.vector_store %arg8[%c0_18, %c0_19, %c0_20], %31 {strides = array<i32>} : memref<1x8x128xf32, #tpu.memory_space<vmem>>, vector<1x8x128xf32>,
    %cst_21 = arith.constant dense<0.000000e+00> : vector<256xf32>
    %32 = vector.multi_reduction <add>, %23, %cst_21 [0] : vector<8x256xf32> to vector<256xf32>
    %33 = vector.shape_cast %32 : vector<256xf32> to vector<1x256xf32>
    %34 = arith.mulf %23, %23 : vector<8x256xf32>
    %cst_22 = arith.constant dense<0.000000e+00> : vector<256xf32>
    %35 = vector.multi_reduction <add>, %34, %cst_22 [0] : vector<8x256xf32> to vector<256xf32>
    %36 = vector.shape_cast %35 : vector<256xf32> to vector<1x256xf32>
    %37 = tpu.concatenate %33, %36 in 0 : vector<1x256xf32>, vector<1x256xf32> -> vector<2x256xf32>
    %c0_23 = arith.constant 0 : index
    %c0_24 = arith.constant 0 : index
    %c0_25 = arith.constant 0 : index
    %38 = vector.load %arg9[%c0_23, %c0_24, %c0_25] : memref<1x2x256xf32, #tpu.memory_space<vmem>>, vector<1x2x256xf32>
    %39 = vector.shape_cast %38 : vector<1x2x256xf32> to vector<2x256xf32>
    %40 = vector.shape_cast %37 : vector<2x256xf32> to vector<1x2x256xf32>
    tpu.vector_store %arg9[%c0_23, %c0_24, %c0_25], %40 {strides = array<i32>} : memref<1x2x256xf32, #tpu.memory_space<vmem>>, vector<1x2x256xf32>,
    return
  }
  func.func @transform_0(%arg0: i32) -> (i32, i32, i32) {
    %c0_i32 = arith.constant 0 : i32
    %c0_i32_0 = arith.constant 0 : i32
    %c0_i32_1 = arith.constant 0 : i32
    return %arg0, %c0_i32, %c0_i32_0 : i32, i32, i32
  }
  func.func @transform_1(%arg0: i32) -> (i32, i32) {
    %c0_i32 = arith.constant 0 : i32
    %c0_i32_0 = arith.constant 0 : i32
    %c0_i32_1 = arith.constant 0 : i32
    return %c0_i32, %c0_i32_0 : i32, i32
  }
  func.func @transform_2(%arg0: i32) -> (i32, i32) {
    %c0_i32 = arith.constant 0 : i32
    %c0_i32_0 = arith.constant 0 : i32
    %c0_i32_1 = arith.constant 0 : i32
    return %c0_i32, %c0_i32_0 : i32, i32
  }
  func.func @transform_3(%arg0: i32) -> (i32, i32, i32) {
    %c0_i32 = arith.constant 0 : i32
    %c0_i32_0 = arith.constant 0 : i32
    %c0_i32_1 = arith.constant 0 : i32
    return %arg0, %c0_i32, %c0_i32_0 : i32, i32, i32
  }
  func.func @transform_4(%arg0: i32) -> (i32, i32) {
    %c0_i32 = arith.constant 0 : i32
    %c0_i32_0 = arith.constant 0 : i32
    %c0_i32_1 = arith.constant 0 : i32
    return %c0_i32, %c0_i32_0 : i32, i32
  }
  func.func @transform_5(%arg0: i32) -> (i32, i32) {
    %c0_i32 = arith.constant 0 : i32
    %c0_i32_0 = arith.constant 0 : i32
    %c0_i32_1 = arith.constant 0 : i32
    return %c0_i32, %c0_i32_0 : i32, i32
  }
  func.func @transform_6(%arg0: i32) -> (i32, i32, i32) {
    %c0_i32 = arith.constant 0 : i32
    %c0_i32_0 = arith.constant 0 : i32
    %c0_i32_1 = arith.constant 0 : i32
    return %arg0, %c0_i32, %c0_i32_0 : i32, i32, i32
  }
  func.func @transform_7(%arg0: i32) -> (i32, i32, i32) {
    %c0_i32 = arith.constant 0 : i32
    %c0_i32_0 = arith.constant 0 : i32
    %c0_i32_1 = arith.constant 0 : i32
    return %arg0, %c0_i32, %c0_i32_0 : i32, i32, i32
  }
  func.func @transform_8(%arg0: i32) -> (i32, i32, i32) {
    %c0_i32 = arith.constant 0 : i32
    %c0_i32_0 = arith.constant 0 : i32
    %c0_i32_1 = arith.constant 0 : i32
    return %arg0, %c0_i32, %c0_i32_0 : i32, i32, i32
  }
}

module attributes {stable_mosaic.version = 11 : i64} {
  func.func @_conv3_kernel(%arg0: i32, %arg1: memref<1x8x128xf32, #tpu.memory_space<vmem>>, %arg2: memref<1x128xf32, #tpu.memory_space<vmem>>, %arg3: memref<1x128xf32, #tpu.memory_space<vmem>>, %arg4: memref<384x128xf32, #tpu.memory_space<vmem>>, %arg5: memref<1x128xf32, #tpu.memory_space<vmem>>, %arg6: memref<1x8x128xf32, #tpu.memory_space<vmem>>, %arg7: memref<1x2x128xf32, #tpu.memory_space<vmem>>) attributes {dimension_semantics = [#tpu.dimension_semantics<parallel>], iteration_bounds = array<i64: 2>, scalar_prefetch = 0 : i64, scratch_operands = 0 : i64, tpu.core_type = #tpu.core_type<tc>, window_params = [{transform_indices = @transform_0, window_bounds = array<i64: 1, 8, 128>}, {pipeline_mode = #tpu.pipeline_mode<synchronous>, transform_indices = @transform_1, window_bounds = array<i64: 1, 128>}, {pipeline_mode = #tpu.pipeline_mode<synchronous>, transform_indices = @transform_2, window_bounds = array<i64: 1, 128>}, {pipeline_mode = #tpu.pipeline_mode<synchronous>, transform_indices = @transform_3, window_bounds = array<i64: 384, 128>}, {pipeline_mode = #tpu.pipeline_mode<synchronous>, transform_indices = @transform_4, window_bounds = array<i64: 1, 128>}, {transform_indices = @transform_5, window_bounds = array<i64: 1, 8, 128>}, {transform_indices = @transform_6, window_bounds = array<i64: 1, 2, 128>}]} {
    %c0 = arith.constant 0 : index
    %c0_0 = arith.constant 0 : index
    %c0_1 = arith.constant 0 : index
    %0 = vector.load %arg1[%c0, %c0_0, %c0_1] : memref<1x8x128xf32, #tpu.memory_space<vmem>>, vector<1x8x128xf32>
    %1 = vector.shape_cast %0 : vector<1x8x128xf32> to vector<8x128xf32>
    %c0_2 = arith.constant 0 : index
    %c0_3 = arith.constant 0 : index
    %2 = vector.load %arg2[%c0_2, %c0_3] : memref<1x128xf32, #tpu.memory_space<vmem>>, vector<1x128xf32>
    %3 = vector.broadcast %2 : vector<1x128xf32> to vector<8x128xf32>
    %4 = arith.mulf %1, %3 : vector<8x128xf32>
    %c0_4 = arith.constant 0 : index
    %c0_5 = arith.constant 0 : index
    %5 = vector.load %arg3[%c0_4, %c0_5] : memref<1x128xf32, #tpu.memory_space<vmem>>, vector<1x128xf32>
    %6 = vector.broadcast %5 : vector<1x128xf32> to vector<8x128xf32>
    %7 = arith.addf %4, %6 : vector<8x128xf32>
    %cst = arith.constant 0.000000e+00 : f32
    %8 = vector.broadcast %cst : f32 to vector<8x128xf32>
    %9 = arith.maximumf %7, %8 : vector<8x128xf32>
    %cst_6 = arith.constant 0.000000e+00 : f32
    %10 = vector.broadcast %cst_6 : f32 to vector<1x128xf32>
    %11 = vector.extract_strided_slice %9 {offsets = [0, 0], sizes = [7, 128], strides = [1, 1]} : vector<8x128xf32> to vector<7x128xf32>
    %12 = tpu.concatenate %10, %11 in 0 : vector<1x128xf32>, vector<7x128xf32> -> vector<8x128xf32>
    %13 = vector.extract_strided_slice %9 {offsets = [1, 0], sizes = [7, 128], strides = [1, 1]} : vector<8x128xf32> to vector<7x128xf32>
    %14 = tpu.concatenate %13, %10 in 0 : vector<7x128xf32>, vector<1x128xf32> -> vector<8x128xf32>
    %15 = tpu.concatenate %12, %9, %14 in 1 : vector<8x128xf32>, vector<8x128xf32>, vector<8x128xf32> -> vector<8x384xf32>
    %c0_7 = arith.constant 0 : index
    %c0_8 = arith.constant 0 : index
    %16 = vector.load %arg4[%c0_7, %c0_8] : memref<384x128xf32, #tpu.memory_space<vmem>>, vector<384x128xf32>
    %cst_9 = arith.constant dense<0.000000e+00> : vector<8x128xf32>
    %17 = tpu.matmul %15, %16, %cst_9 {dimension_numbers = #tpu.dot_dimension_numbers<[1], [0], [0], [1], [0, 0, 1, 1], [], []>} : vector<8x384xf32>, vector<384x128xf32>, vector<8x128xf32> -> vector<8x128xf32>
    %c0_10 = arith.constant 0 : index
    %c0_11 = arith.constant 0 : index
    %18 = vector.load %arg5[%c0_10, %c0_11] : memref<1x128xf32, #tpu.memory_space<vmem>>, vector<1x128xf32>
    %19 = vector.broadcast %18 : vector<1x128xf32> to vector<8x128xf32>
    %20 = arith.addf %17, %19 : vector<8x128xf32>
    %c0_12 = arith.constant 0 : index
    %c0_13 = arith.constant 0 : index
    %c0_14 = arith.constant 0 : index
    %21 = vector.load %arg6[%c0_12, %c0_13, %c0_14] : memref<1x8x128xf32, #tpu.memory_space<vmem>>, vector<1x8x128xf32>
    %22 = vector.shape_cast %21 : vector<1x8x128xf32> to vector<8x128xf32>
    %23 = vector.shape_cast %20 : vector<8x128xf32> to vector<1x8x128xf32>
    tpu.vector_store %arg6[%c0_12, %c0_13, %c0_14], %23 {strides = array<i32>} : memref<1x8x128xf32, #tpu.memory_space<vmem>>, vector<1x8x128xf32>,
    %cst_15 = arith.constant dense<0.000000e+00> : vector<128xf32>
    %24 = vector.multi_reduction <add>, %20, %cst_15 [0] : vector<8x128xf32> to vector<128xf32>
    %25 = vector.shape_cast %24 : vector<128xf32> to vector<1x128xf32>
    %26 = arith.mulf %20, %20 : vector<8x128xf32>
    %cst_16 = arith.constant dense<0.000000e+00> : vector<128xf32>
    %27 = vector.multi_reduction <add>, %26, %cst_16 [0] : vector<8x128xf32> to vector<128xf32>
    %28 = vector.shape_cast %27 : vector<128xf32> to vector<1x128xf32>
    %29 = tpu.concatenate %25, %28 in 0 : vector<1x128xf32>, vector<1x128xf32> -> vector<2x128xf32>
    %c0_17 = arith.constant 0 : index
    %c0_18 = arith.constant 0 : index
    %c0_19 = arith.constant 0 : index
    %30 = vector.load %arg7[%c0_17, %c0_18, %c0_19] : memref<1x2x128xf32, #tpu.memory_space<vmem>>, vector<1x2x128xf32>
    %31 = vector.shape_cast %30 : vector<1x2x128xf32> to vector<2x128xf32>
    %32 = vector.shape_cast %29 : vector<2x128xf32> to vector<1x2x128xf32>
    tpu.vector_store %arg7[%c0_17, %c0_18, %c0_19], %32 {strides = array<i32>} : memref<1x2x128xf32, #tpu.memory_space<vmem>>, vector<1x2x128xf32>,
    return
  }
  func.func @transform_0(%arg0: i32) -> (i32, i32, i32) {
    %c0_i32 = arith.constant 0 : i32
    %c0_i32_0 = arith.constant 0 : i32
    %c0_i32_1 = arith.constant 0 : i32
    return %arg0, %c0_i32, %c0_i32_0 : i32, i32, i32
  }
  func.func @transform_1(%arg0: i32) -> (i32, i32) {
    %c0_i32 = arith.constant 0 : i32
    %c0_i32_0 = arith.constant 0 : i32
    %c0_i32_1 = arith.constant 0 : i32
    return %c0_i32, %c0_i32_0 : i32, i32
  }
  func.func @transform_2(%arg0: i32) -> (i32, i32) {
    %c0_i32 = arith.constant 0 : i32
    %c0_i32_0 = arith.constant 0 : i32
    %c0_i32_1 = arith.constant 0 : i32
    return %c0_i32, %c0_i32_0 : i32, i32
  }
  func.func @transform_3(%arg0: i32) -> (i32, i32) {
    %c0_i32 = arith.constant 0 : i32
    %c0_i32_0 = arith.constant 0 : i32
    %c0_i32_1 = arith.constant 0 : i32
    return %c0_i32, %c0_i32_0 : i32, i32
  }
  func.func @transform_4(%arg0: i32) -> (i32, i32) {
    %c0_i32 = arith.constant 0 : i32
    %c0_i32_0 = arith.constant 0 : i32
    %c0_i32_1 = arith.constant 0 : i32
    return %c0_i32, %c0_i32_0 : i32, i32
  }
  func.func @transform_5(%arg0: i32) -> (i32, i32, i32) {
    %c0_i32 = arith.constant 0 : i32
    %c0_i32_0 = arith.constant 0 : i32
    %c0_i32_1 = arith.constant 0 : i32
    return %arg0, %c0_i32, %c0_i32_0 : i32, i32, i32
  }
  func.func @transform_6(%arg0: i32) -> (i32, i32, i32) {
    %c0_i32 = arith.constant 0 : i32
    %c0_i32_0 = arith.constant 0 : i32
    %c0_i32_1 = arith.constant 0 : i32
    return %arg0, %c0_i32, %c0_i32_0 : i32, i32, i32
  }
}

module attributes {stable_mosaic.version = 11 : i64} {
  func.func @_residual2_pool_kernel(%arg0: i32, %arg1: memref<8x256xf32, #tpu.memory_space<vmem>>, %arg2: memref<1x256xf32, #tpu.memory_space<vmem>>, %arg3: memref<1x256xf32, #tpu.memory_space<vmem>>, %arg4: memref<8x256xf32, #tpu.memory_space<vmem>>, %arg5: memref<1x256xf32, #tpu.memory_space<vmem>>, %arg6: memref<1x256xf32, #tpu.memory_space<vmem>>, %arg7: memref<8x128xf32, #tpu.memory_space<vmem>>) attributes {dimension_semantics = [#tpu.dimension_semantics<parallel>], iteration_bounds = array<i64: 1>, scalar_prefetch = 0 : i64, scratch_operands = 0 : i64, tpu.core_type = #tpu.core_type<tc>, window_params = [{transform_indices = @transform_0, window_bounds = array<i64: 8, 256>}, {pipeline_mode = #tpu.pipeline_mode<synchronous>, transform_indices = @transform_1, window_bounds = array<i64: 1, 256>}, {pipeline_mode = #tpu.pipeline_mode<synchronous>, transform_indices = @transform_2, window_bounds = array<i64: 1, 256>}, {transform_indices = @transform_3, window_bounds = array<i64: 8, 256>}, {pipeline_mode = #tpu.pipeline_mode<synchronous>, transform_indices = @transform_4, window_bounds = array<i64: 1, 256>}, {pipeline_mode = #tpu.pipeline_mode<synchronous>, transform_indices = @transform_5, window_bounds = array<i64: 1, 256>}, {transform_indices = @transform_6, window_bounds = array<i64: 8, 128>}]} {
    %c0 = arith.constant 0 : index
    %c0_0 = arith.constant 0 : index
    %0 = vector.load %arg1[%c0, %c0_0] : memref<8x256xf32, #tpu.memory_space<vmem>>, vector<8x256xf32>
    %c0_1 = arith.constant 0 : index
    %c0_2 = arith.constant 0 : index
    %1 = vector.load %arg2[%c0_1, %c0_2] : memref<1x256xf32, #tpu.memory_space<vmem>>, vector<1x256xf32>
    %2 = vector.broadcast %1 : vector<1x256xf32> to vector<8x256xf32>
    %3 = arith.mulf %0, %2 : vector<8x256xf32>
    %c0_3 = arith.constant 0 : index
    %c0_4 = arith.constant 0 : index
    %4 = vector.load %arg3[%c0_3, %c0_4] : memref<1x256xf32, #tpu.memory_space<vmem>>, vector<1x256xf32>
    %5 = vector.broadcast %4 : vector<1x256xf32> to vector<8x256xf32>
    %6 = arith.addf %3, %5 : vector<8x256xf32>
    %c0_5 = arith.constant 0 : index
    %c0_6 = arith.constant 0 : index
    %7 = vector.load %arg4[%c0_5, %c0_6] : memref<8x256xf32, #tpu.memory_space<vmem>>, vector<8x256xf32>
    %c0_7 = arith.constant 0 : index
    %c0_8 = arith.constant 0 : index
    %8 = vector.load %arg5[%c0_7, %c0_8] : memref<1x256xf32, #tpu.memory_space<vmem>>, vector<1x256xf32>
    %9 = vector.broadcast %8 : vector<1x256xf32> to vector<8x256xf32>
    %10 = arith.mulf %7, %9 : vector<8x256xf32>
    %11 = arith.addf %6, %10 : vector<8x256xf32>
    %c0_9 = arith.constant 0 : index
    %c0_10 = arith.constant 0 : index
    %12 = vector.load %arg6[%c0_9, %c0_10] : memref<1x256xf32, #tpu.memory_space<vmem>>, vector<1x256xf32>
    %13 = vector.broadcast %12 : vector<1x256xf32> to vector<8x256xf32>
    %14 = arith.addf %11, %13 : vector<8x256xf32>
    %cst = arith.constant 0.000000e+00 : f32
    %15 = vector.broadcast %cst : f32 to vector<8x256xf32>
    %16 = arith.maximumf %14, %15 : vector<8x256xf32>
    %17 = vector.extract_strided_slice %16 {offsets = [0, 0], sizes = [8, 128], strides = [1, 1]} : vector<8x256xf32> to vector<8x128xf32>
    %18 = vector.extract_strided_slice %16 {offsets = [0, 128], sizes = [8, 128], strides = [1, 1]} : vector<8x256xf32> to vector<8x128xf32>
    %19 = arith.maximumf %17, %18 : vector<8x128xf32>
    %c0_11 = arith.constant 0 : index
    %c0_12 = arith.constant 0 : index
    %20 = vector.load %arg7[%c0_11, %c0_12] : memref<8x128xf32, #tpu.memory_space<vmem>>, vector<8x128xf32>
    tpu.vector_store %arg7[%c0_11, %c0_12], %19 {strides = array<i32>} : memref<8x128xf32, #tpu.memory_space<vmem>>, vector<8x128xf32>,
    return
  }
  func.func @transform_0(%arg0: i32) -> (i32, i32) {
    %c0_i32 = arith.constant 0 : i32
    %c0_i32_0 = arith.constant 0 : i32
    return %arg0, %c0_i32 : i32, i32
  }
  func.func @transform_1(%arg0: i32) -> (i32, i32) {
    %c0_i32 = arith.constant 0 : i32
    %c0_i32_0 = arith.constant 0 : i32
    %c0_i32_1 = arith.constant 0 : i32
    return %c0_i32, %c0_i32_0 : i32, i32
  }
  func.func @transform_2(%arg0: i32) -> (i32, i32) {
    %c0_i32 = arith.constant 0 : i32
    %c0_i32_0 = arith.constant 0 : i32
    %c0_i32_1 = arith.constant 0 : i32
    return %c0_i32, %c0_i32_0 : i32, i32
  }
  func.func @transform_3(%arg0: i32) -> (i32, i32) {
    %c0_i32 = arith.constant 0 : i32
    %c0_i32_0 = arith.constant 0 : i32
    return %arg0, %c0_i32 : i32, i32
  }
  func.func @transform_4(%arg0: i32) -> (i32, i32) {
    %c0_i32 = arith.constant 0 : i32
    %c0_i32_0 = arith.constant 0 : i32
    %c0_i32_1 = arith.constant 0 : i32
    return %c0_i32, %c0_i32_0 : i32, i32
  }
  func.func @transform_5(%arg0: i32) -> (i32, i32) {
    %c0_i32 = arith.constant 0 : i32
    %c0_i32_0 = arith.constant 0 : i32
    %c0_i32_1 = arith.constant 0 : i32
    return %c0_i32, %c0_i32_0 : i32, i32
  }
  func.func @transform_6(%arg0: i32) -> (i32, i32) {
    %c0_i32 = arith.constant 0 : i32
    %c0_i32_0 = arith.constant 0 : i32
    return %arg0, %c0_i32 : i32, i32
  }
}

</mosaic_0001>

<bundles_post_ra>
// kernel: rescnn_forward.8
= control target key start
LH: loop header
LB: loop body
LE: loop exit
PB: predicated region body
PF: predicated region fallthrough
CT: control target
= control target key end

     0   :  { %s56_s18 = smov 64   ;;  %vm48_vm0 = vcmask 523264   ;;  %s92_s0 = inlined_call_operand.vmem [shape: f32[8,256], index: 0, kind: input, shape index: {}]   ;;  %s93_s1 = inlined_call_operand.vmem [shape: f32[1,256], index: 1, kind: input, shape index: {}]   ;;  %s94_s2 = inlined_call_operand.vmem [shape: f32[1,256], index: 2, kind: input, shape index: {}]   ;;  %s95_s3 = inlined_call_operand.vmem [shape: f32[8,128], index: 3, kind: output, shape index: {}]  }
   0x1   :  { %v15_v0 = vld [vmem:[%s92_s0 + $0x8] sm:$0xff]  ;;  %v16_v1 = vld [vmem:[%s93_s1] sm:$0x3] }
   0x2   :  { %v24_v2 = vld [vmem:[%s94_s2] sm:$0x3]  ;;  %v19_v3 = vperm.slane %v16_v1, 1  ;;  %v18_v8 = vperm.slane %v16_v1, 0 }
   0x3   :  { %v27_v4 = vperm.slane %v24_v2, 1  ;;  %v14_v9 = vld [vmem:[%s92_s0] sm:$0xff]  ;;  %v26_v10 = vperm.slane %v24_v2, 0 }
   0x4   :  { %v23_v5 = vmul.f32 %v19_v3, %v15_v0  ;;  %v22_v11 = vmul.f32 %v18_v8, %v14_v9 }
   0x6   :  { %v31_v6 = vadd.f32 %v27_v4, %v23_v5  ;;  %v30_v12 = vadd.f32 %v26_v10, %v22_v11 }
   0x8   :  { %v33_v7 = vmax.f32 %v31_v6, 0.0  ;;  %v32_v13 = vmax.f32 %v30_v12, 0.0 }
   0xa   :  { %40 = vrot.lane.b32.xlu0 %v33_v7, %s56_s18 }
  0x12   :  { %35 = vrot.lane.b32.xlu0 %v32_v13, %s56_s18 }
  0x7c   :  { %v41_v14 = vpop.permute.xlu0 %40 }
  0x7d   :  { %v43_v15 = vmax.f32 %v33_v7, %v41_v14 }
  0x7f   :  { %45 = vrot.lane.b32.xlu1 %v43_v15, %s56_s18 }
  0x84   :  { %v36_v16 = vpop.permute.xlu0 %35 }
  0x85   :  { %v38_v17 = vmax.f32 %v32_v13, %v36_v16 }
  0xf1   :  { %v46_v18 = vpop.permute.xlu1 %45 }
  0xf2   :  { %v49_v19 = vsel %vm48_vm0, %v38_v17, %v46_v18 }
  0xf3   :  { %50 = vst [vmem:[%s95_s3] sm:$0xff] %v49_v19 }

// kernel: rescnn_forward.7
= control target key start
LH: loop header
LB: loop body
LE: loop exit
PB: predicated region body
PF: predicated region fallthrough
CT: control target
= control target key end

     0   :  { %s449_s15 = smov 0   ;;  %s498_s0 = inlined_call_operand.vmem [shape: f32[2,16,1], index: 0, kind: input, shape index: {}]   ;;  %s499_s1 = inlined_call_operand.vmem [shape: f32[3,64], index: 1, kind: input, shape index: {}]   ;;  %s500_s2 = inlined_call_operand.vmem [shape: f32[1,64], index: 2, kind: input, shape index: {}]   ;;  %s501_s3 = inlined_call_operand.vmem [shape: f32[2,16,64], index: 3, kind: output, shape index: {0}]   ;;  %s502_s4 = inlined_call_operand.vmem [shape: f32[2,2,64], index: 4, kind: output, shape index: {1}]  }
   0x1 LB: > { %s385_s16 = sadd.s32 4294967295, %s421_s15   ;;  %p389_p0 = scmp.ge.s32.totalorder %s421_s15, 1  ;;  %s421_s15 = sphi %s449_s15, %s15_s15  }
   0x2   : > { %p165_p1 = scmp.lt.s32.totalorder %s421_s15, 3 }
   0x4   : > { %p166_p2 = pnand %p389_p0, %p165_p1 }
   0x5   : > { %p195_p3 = scmp.lt.s32.totalorder (!%p166_p2), %s385_s16, 1 }
   0x6   : > { %169 = sbr.rel (%p166_p2) target bundleno = 168 (0xa8), region = 32 }
   0xb   : > { %v423_v0 = vmov 0   ;;  %s504_s16 = smov (!%p195_p3, %s385_s16), 1  ;;  %vm213_vm0 = vcmask 1040384   ;;  %vm219_vm1 = vcmask 1046528   ;;  %v412_v11 = vld [vmem:[%s499_s1 + $0x1] ss:$0 sm:$0xff] }
   0xc   : > { %409 = vset.pattern.permute.xlu1 %v423_v0  ;;  %408 = vset.pattern.permute.xlu0 %v423_v0  ;;  %s397_s17 = sshll.u32 %s504_s16, 4  ;;  %v411_v12 = vld [vmem:[%s499_s1 + $0x2] ss:$0 sm:$0xff]  ;;  %v413_v14 = vld [vmem:[%s499_s1] ss:$0 sm:$0xff]  ;;  %vm273_vm2 = vcmask 523264  }
   0xd   : > { %410 = vset.pattern.permute.xlu2 %v423_v0  ;;  %s199_s20 = scalar_lea.vmem %s498_s0, %s397_s17  ;;  %v414_v20 = vld [vmem:[%s500_s2] ss:$0 sm:$0xff]  ;;  %s204_s5 = scalar_lea.vmem %s501_s3, %s397_s17  ;;  %vm297_vm3 = vcmask 517120  }
   0xe   : > { %v209_v1 = vld [vmem:[%s199_s20] sm:$0xff]  ;;  %v210_v2 = vld [vmem:[%s199_s20 + $0x8] sm:$0xff]  ;;  %s394_s6 = sshll.u32 %s504_s16, 1 }
   0xf   : > { %240 = vperm.xlu1 %409, %v209_v1   ;;  %v220_v3 = vrot.slane %v209_v1, 1  ;;  %v214_v4 = vrot.slane %v209_v1, 7  ;;  %v221_v5 = vrot.slane %v210_v2, 1  ;;  %v215_v8 = vrot.slane %v210_v2, 7  ;;  %s208_s9 = scalar_lea.vmem %s502_s4, %s394_s6 }
  0x11   : > { %v218_v6 = vsel %vm213_vm0, 0.0, %v214_v4  ;;  %v222_v7 = vsel %vm219_vm1, %v220_v3, %v221_v5  ;;  %v216_v9 = vsel %vm213_vm0, %v214_v4, %v215_v8  ;;  %v224_v10 = vsel %vm219_vm1, %v221_v5, 0.0 }
  0x12   : > { %228 = vperm.xlu0 %408, %v218_v6   ;;  %254 = vperm.xlu2 %410, %v222_v7  }
  0x17   : > { %244 = vperm.xlu1 %409, %v210_v2  }
  0x1a   : > { %232 = vperm.xlu0 %408, %v216_v9   ;;  %259 = vperm.xlu2 %410, %v224_v10  }
  0x6c   : > { %v255_v15 = vpop.permute.xlu2 %254 }
  0x6d   : > { %v263_v18 = vmul.f32 %v411_v12, %v255_v15 }
  0x74   : > { %v260_v25 = vpop.permute.xlu2 %259 }
  0x75   : > { %v264_v29 = vmul.f32 %v411_v12, %v260_v25 }
  0x81   : > { %v241_v13 = vpop.permute.xlu1 %240 }
  0x82   : > { %v248_v16 = vmul.f32 %v412_v11, %v241_v13 }
  0x84   : > { %v229_v17 = vpop.permute.xlu0 %228 }
  0x85   : > { %v236_v19 = vmul.f32 %v413_v14, %v229_v17 }
  0x87   : > { %v250_v21 = vadd.f32 %v248_v16, %v236_v19 }
  0x89   : > { %v265_v22 = vadd.f32 %v263_v18, %v250_v21  ;;  %v245_v23 = vpop.permute.xlu1 %244 }
  0x8a   : > { %v249_v27 = vmul.f32 %v412_v11, %v245_v23 }
  0x8b   : > { %v271_v24 = vadd.f32 %v414_v20, %v265_v22 }
  0x8c   : > { %v233_v26 = vpop.permute.xlu0 %232 }
  0x8d   : > { %274 = vst.msk [vmem:[%s204_s5] sm:$0xff] %vm273_vm2, %v271_v24  ;;  %v237_v28 = vmul.f32 %v413_v14, %v233_v26  ;;  %v285_v32 = vmul.f32 %v271_v24, %v271_v24  ;;  %v276_v34 = vsel %vm273_vm2, %v271_v24, 0.0 }
  0x8f   : > { %v251_v30 = vadd.f32 %v249_v27, %v237_v28  ;;  %v287_v38 = vsel %vm273_vm2, %v285_v32, 0.0 }
  0x91   : > { %v266_v31 = vadd.f32 %v264_v29, %v251_v30 }
  0x93   : > { %v272_v33 = vadd.f32 %v414_v20, %v266_v31 }
  0x95   : > { %275 = vst.msk [vmem:[%s204_s5 + $0x8] sm:$0xff] %vm273_vm2, %v272_v33  ;;  %v277_v35 = vsel %vm273_vm2, %v272_v33, 0.0  ;;  %v286_v36 = vmul.f32 %v272_v33, %v272_v33 }
  0x96   : > { %v278_v37 = vadd.f32 %v277_v35, %v276_v34 }
  0x97   : > { %v288_v39 = vsel %vm273_vm2, %v286_v36, 0.0 }
  0x98   : > { %v279_v40 = vrot.slane %v278_v37, 4  ;;  %v289_v41 = vadd.f32 %v288_v39, %v287_v38 }
  0x9a   : > { %v280_v42 = vadd.f32 %v279_v40, %v278_v37  ;;  %v290_v43 = vrot.slane %v289_v41, 4 }
  0x9c   : > { %v281_v44 = vrot.slane %v280_v42, 2  ;;  %v291_v45 = vadd.f32 %v290_v43, %v289_v41 }
  0x9e   : > { %v282_v46 = vadd.f32 %v281_v44, %v280_v42  ;;  %v292_v47 = vrot.slane %v291_v45, 2 }
  0xa0   : > { %v283_v48 = vrot.slane %v282_v46, 1  ;;  %v293_v49 = vadd.f32 %v292_v47, %v291_v45 }
  0xa2   : > { %v294_v50 = vrot.slane %v293_v49, 1  ;;  %v284_v51 = vadd.f32 %v283_v48, %v282_v46 }
  0xa4   : > { %v295_v52 = vadd.f32 %v294_v50, %v293_v49 }
  0xa6   : > { %v296_v53 = vsel %vm213_vm0, %v284_v51, %v295_v52 }
  0xa7   : > { %298 = vst.msk [vmem:[%s208_s9] sm:$0x3] %vm297_vm3, %v296_v53 }
  0xa8 PF: > { %s15_s15 = sadd.s32 1, %s421_s15  }
  0xa9   : > { %p12_p4 = scmp.ge.s32.totalorder %s15_s15, 4  }
  0xab   :  { %14 = sbr.rel (!%p12_p4) target bundleno = 1 (0x1), region = 74 }

// kernel: rescnn_forward.9
= control target key start
LH: loop header
LB: loop body
LE: loop exit
PB: predicated region body
PF: predicated region fallthrough
CT: control target
= control target key end

     0   :  { %s448_s15 = smov 0   ;;  %s558_s0 = inlined_call_operand.vmem [shape: f32[2,8,64], index: 0, kind: input, shape index: {}]   ;;  %s559_s1 = inlined_call_operand.vmem [shape: f32[192,64], index: 1, kind: input, shape index: {}]   ;;  %s560_s2 = inlined_call_operand.vmem [shape: f32[1,64], index: 2, kind: input, shape index: {}]   ;;  %s561_s3 = inlined_call_operand.vmem [shape: f32[2,8,64], index: 3, kind: output, shape index: {0}]   ;;  %s562_s4 = inlined_call_operand.vmem [shape: f32[2,2,64], index: 4, kind: output, shape index: {1}]  }
   0x1 LB: > { %s393_s16 = sadd.s32 4294967295, %s420_s15   ;;  %p397_p0 = scmp.ge.s32.totalorder %s420_s15, 1  ;;  %s420_s15 = sphi %s448_s15, %s15_s15  }
   0x2   : > { %p164_p1 = scmp.lt.s32.totalorder %s420_s15, 3 }
   0x4   : > { %p165_p2 = pnand %p397_p0, %p164_p1 }
   0x5   : > { %p192_p3 = scmp.lt.s32.totalorder (!%p165_p2), %s393_s16, 1  ;;  %s422_s11 = smov (!%p165_p2), 64  }
   0x6   : > { %168 = sbr.rel (%p165_p2) target bundleno = 278 (0x116), region = 32 }
   0xb   : > { %v234_v0 = vld [vmem:[%s559_s1 + $0x78] sm:$0xff]  ;;  %v233_v1 = vld [vmem:[%s559_s1 + $0x70] sm:$0xff]  ;;  %s564_s16 = smov (!%p192_p3, %s393_s16), 1  ;;  %v232_v2 = vld [vmem:[%s559_s1 + $0x68] sm:$0xff]  ;;  %vm212_vm0 = vcmask 1046528   ;;  %vm217_vm1 = vcmask 523264  }
   0xc   : > { %250 = vmatpush.msra.mxu0 %v234_v0  ;;  %v242_v3 = vld [vmem:[%s559_s1 + $0xb8] sm:$0xff]  ;;  %s398_s25 = sshll.u32 %s564_s16, 3  ;;  %v231_v4 = vld [vmem:[%s559_s1 + $0x60] sm:$0xff]  ;;  %v241_v5 = vld [vmem:[%s559_s1 + $0xb0] sm:$0xff]  ;;  %vm208_vm2 = vcmask 1040384   ;;  %s400_s29 = sshll.u32 %s564_s16, 1 }
   0xd   : > { %278 = vmatpush.msra.mxu1 %v242_v3  ;;  %s195_s6 = scalar_lea.vmem %s558_s0, %s398_s25  ;;  %v240_v6 = vld [vmem:[%s559_s1 + $0xa8] sm:$0xff]  ;;  %v230_v8 = vld [vmem:[%s559_s1 + $0x58] sm:$0xff]  ;;  %v239_v9 = vld [vmem:[%s559_s1 + $0xa0] sm:$0xff]  ;;  %s199_s28 = scalar_lea.vmem %s561_s3, %s398_s25  ;;  %vm307_vm3 = vcmask 517120  }
   0xe   : > { %251 = vmatpush.msra.mxu0 %v233_v1  ;;  %v204_v7 = vld [vmem:[%s195_s6] sm:$0xff]  ;;  %v229_v10 = vld [vmem:[%s559_s1 + $0x50] sm:$0xff]  ;;  %v238_v11 = vld [vmem:[%s559_s1 + $0x98] sm:$0xff]  ;;  %s203_s5 = scalar_lea.vmem %s562_s4, %s400_s29 }
   0xf   : > { %279 = vmatpush.msra.mxu1 %v241_v5  ;;  %214 = vrot.lane.b32.xlu0 %v204_v7, %s422_s11  ;;  %v228_v12 = vld [vmem:[%s559_s1 + $0x48] sm:$0xff]  ;;  %v237_v13 = vld [vmem:[%s559_s1 + $0x90] sm:$0xff]  ;;  %v227_v14 = vld [vmem:[%s559_s1 + $0x40] sm:$0xff]  ;;  %v210_v24 = vrot.slane %v204_v7, 1  ;;  %v206_v27 = vrot.slane %v204_v7, 7 }
  0x10   : > { %252 = vmatpush.msra.mxu0 %v232_v2  ;;  %v226_v15 = vld [vmem:[%s559_s1 + $0x38] sm:$0xff]  ;;  %v225_v16 = vld [vmem:[%s559_s1 + $0x30] sm:$0xff]  ;;  %v224_v17 = vld [vmem:[%s559_s1 + $0x28] sm:$0xff] }
  0x11   : > { %280 = vmatpush.msra.mxu1 %v240_v6  ;;  %v223_v18 = vld [vmem:[%s559_s1 + $0x20] sm:$0xff]  ;;  %v222_v19 = vld [vmem:[%s559_s1 + $0x18] sm:$0xff]  ;;  %v221_v20 = vld [vmem:[%s559_s1 + $0x10] sm:$0xff]  ;;  %v213_v26 = vsel %vm212_vm0, %v210_v24, 0.0  ;;  %v209_v28 = vsel %vm208_vm2, 0.0, %v206_v27 }
  0x12   : > { %253 = vmatpush.msra.mxu0 %v231_v4  ;;  %v220_v21 = vld [vmem:[%s559_s1 + $0x8] sm:$0xff]  ;;  %v219_v22 = vld [vmem:[%s559_s1] sm:$0xff] }
  0x13   : > { %281 = vmatpush.msra.mxu1 %v239_v9  ;;  %v236_v23 = vld [vmem:[%s559_s1 + $0x88] sm:$0xff]  ;;  %v235_v25 = vld [vmem:[%s559_s1 + $0x80] sm:$0xff] }
  0x14   : > { %254 = vmatpush.msra.mxu0 %v230_v8  ;;  %v413_v31 = vld [vmem:[%s560_s2] ss:$0 sm:$0xff] }
  0x15   : > { %282 = vmatpush.msra.mxu1 %v238_v11 }
  0x16   : > { %255 = vmatpush.msra.mxu0 %v229_v10 }
  0x17   : > { %283 = vmatpush.msra.mxu1 %v237_v13 }
  0x18   : > { %256 = vmatpush.msra.mxu0 %v228_v12 }
  0x19   : > { %284 = vmatpush.msra.mxu1 %v236_v23 }
  0x1a   : > { %257 = vmatpush.msra.mxu0 %v227_v14 }
  0x1b   : > { %285 = vmatpush.msra.mxu1 %v235_v25 }
  0x1c   : > { %258 = vmatpush.msra.mxu0 %v226_v15  ;;  %401 = vmatmul.msk.f32.vlgmr.msra.gmra.mxu1 %vm217_vm1, %v213_v26 }
  0x1e   : > { %259 = vmatpush.msra.mxu0 %v225_v16 }
  0x20   : > { %260 = vmatpush.msra.mxu0 %v224_v17 }
  0x22   : > { %261 = vmatpush.msra.mxu0 %v223_v18 }
  0x24   : > { %262 = vmatpush.msra.mxu0 %v222_v19 }
  0x26   : > { %263 = vmatpush.msra.mxu0 %v221_v20 }
  0x28   : > { %264 = vmatpush.msra.mxu0 %v220_v21 }
  0x2a   : > { %265 = vmatpush.msra.mxu0 %v219_v22 }
  0x81   : > { %v215_v29 = vpop.permute.xlu0 %214 }
  0x82   : > { %v218_v30 = vsel %vm217_vm1, %v209_v28, %v215_v29 }
  0x83   : > { %266 = vmatmul.f32.vlgmr.msra.gmra.mxu0 %v218_v30 }
  0x99   : > { %v287_v33 = vpop.f32.mrf.mxu1 }
 0x100   : > { %v267_v32 = vpop.f32.mrf.mxu0 }
 0x101   : > { %v268_v34 = vadd.f32 %v413_v31, %v267_v32 }
 0x103   : > { %v288_v35 = vadd.f32 %v287_v33, %v268_v34 }
 0x105   : > { %290 = vst.msk [vmem:[%s199_s28] sm:$0xff] %vm217_vm1, %v288_v35  ;;  %v291_v36 = vsel %vm217_vm1, %v288_v35, 0.0  ;;  %v298_v37 = vmul.f32 %v288_v35, %v288_v35 }
 0x106   : > { %v292_v38 = vrot.slane %v291_v36, 4 }
 0x107   : > { %v299_v39 = vsel %vm217_vm1, %v298_v37, 0.0 }
 0x108   : > { %v293_v40 = vadd.f32 %v292_v38, %v291_v36  ;;  %v300_v41 = vrot.slane %v299_v39, 4 }
 0x10a   : > { %v294_v42 = vrot.slane %v293_v40, 2  ;;  %v301_v43 = vadd.f32 %v300_v41, %v299_v39 }
 0x10c   : > { %v295_v44 = vadd.f32 %v294_v42, %v293_v40  ;;  %v302_v45 = vrot.slane %v301_v43, 2 }
 0x10e   : > { %v296_v46 = vrot.slane %v295_v44, 1  ;;  %v303_v47 = vadd.f32 %v302_v45, %v301_v43 }
 0x110   : > { %v304_v48 = vrot.slane %v303_v47, 1  ;;  %v297_v49 = vadd.f32 %v296_v46, %v295_v44 }
 0x112   : > { %v305_v50 = vadd.f32 %v304_v48, %v303_v47 }
 0x114   : > { %v306_v51 = vsel %vm208_vm2, %v297_v49, %v305_v50 }
 0x115   : > { %308 = vst.msk [vmem:[%s203_s5] sm:$0x3] %vm307_vm3, %v306_v51 }
 0x116 PF: > { %s15_s15 = sadd.s32 1, %s420_s15  }
 0x117   : > { %p12_p4 = scmp.ge.s32.totalorder %s15_s15, 4  }
 0x119   :  { %14 = sbr.rel (!%p12_p4) target bundleno = 1 (0x1), region = 74 }

// kernel: rescnn_forward.10
= control target key start
LH: loop header
LB: loop body
LE: loop exit
PB: predicated region body
PF: predicated region fallthrough
CT: control target
= control target key end

     0   :  { %s525_s21 = smov 0   ;;  %s641_s0 = inlined_call_operand.vmem [shape: f32[2,8,64], index: 0, kind: input, shape index: {}]   ;;  %s642_s1 = inlined_call_operand.vmem [shape: f32[1,64], index: 1, kind: input, shape index: {}]   ;;  %s643_s2 = inlined_call_operand.vmem [shape: f32[1,64], index: 2, kind: input, shape index: {}]   ;;  %s644_s3 = inlined_call_operand.vmem [shape: f32[192,64], index: 3, kind: input, shape index: {}]   ;;  %s645_s4 = inlined_call_operand.vmem [shape: f32[1,64], index: 4, kind: input, shape index: {}]   ;;  %s646_s5 = inlined_call_operand.vmem [shape: f32[2,8,64], index: 5, kind: output, shape index: {0}]   ;;  %s647_s6 = inlined_call_operand.vmem [shape: f32[2,2,64], index: 6, kind: output, shape index: {1}]  }
   0x1 LB: > { %s458_s22 = sadd.s32 4294967295, %s487_s21   ;;  %p462_p0 = scmp.ge.s32.totalorder %s487_s21, 1  ;;  %s487_s21 = sphi %s525_s21, %s17_s21  }
   0x2   : > { %p214_p1 = scmp.lt.s32.totalorder %s487_s21, 3 }
   0x4   : > { %p215_p2 = pnand %p462_p0, %p214_p1 }
   0x5   : > { %p246_p3 = scmp.lt.s32.totalorder (!%p215_p2), %s458_s22, 1  ;;  %s489_s10 = smov (!%p215_p2), 64  }
   0x6   : > { %218 = sbr.rel (%p215_p2) target bundleno = 284 (0x11c), region = 40 }
   0xb   : > { %v299_v0 = vld [vmem:[%s644_s3 + $0x78] sm:$0xff]  ;;  %s649_s22 = smov (!%p246_p3, %s458_s22), 1  ;;  %v298_v1 = vld [vmem:[%s644_s3 + $0x70] sm:$0xff]  ;;  %v478_v2 = vld [vmem:[%s642_s1] ss:$0 sm:$0xff]  ;;  %vm277_vm0 = vcmask 1046528  }
   0xc   : > { %315 = vmatpush.msra.mxu0 %v299_v0  ;;  %v297_v3 = vld [vmem:[%s644_s3 + $0x68] sm:$0xff]  ;;  %s463_s7 = sshll.u32 %s649_s22, 3  ;;  %v479_v4 = vld [vmem:[%s643_s2] ss:$0 sm:$0xff]  ;;  %v307_v6 = vld [vmem:[%s644_s3 + $0xb8] sm:$0xff]  ;;  %vm282_vm1 = vcmask 523264  }
   0xd   : > { %s249_s12 = scalar_lea.vmem %s641_s0, %s463_s7  ;;  %v296_v5 = vld [vmem:[%s644_s3 + $0x60] sm:$0xff]  ;;  %v306_v7 = vld [vmem:[%s644_s3 + $0xb0] sm:$0xff]  ;;  %343 = vmatpush.msra.mxu1 %v307_v6  ;;  %v295_v10 = vld [vmem:[%s644_s3 + $0x58] sm:$0xff]  ;;  %vm273_vm2 = vcmask 1040384   ;;  %s253_s18 = scalar_lea.vmem %s646_s5, %s463_s7  ;;  %vm372_vm3 = vcmask 517120  }
   0xe   : > { %316 = vmatpush.msra.mxu0 %v298_v1  ;;  %v258_v8 = vld [vmem:[%s249_s12] sm:$0xff]  ;;  %v305_v11 = vld [vmem:[%s644_s3 + $0xa8] sm:$0xff]  ;;  %v294_v13 = vld [vmem:[%s644_s3 + $0x50] sm:$0xff]  ;;  %s465_s19 = sshll.u32 %s649_s22, 1 }
   0xf   : > { %v263_v9 = vmul.f32 %v478_v2, %v258_v8  ;;  %344 = vmatpush.msra.mxu1 %v306_v7  ;;  %v304_v14 = vld [vmem:[%s644_s3 + $0xa0] sm:$0xff]  ;;  %v293_v16 = vld [vmem:[%s644_s3 + $0x48] sm:$0xff]  ;;  %v303_v17 = vld [vmem:[%s644_s3 + $0x98] sm:$0xff]  ;;  %s257_s23 = scalar_lea.vmem %s647_s6, %s465_s19 }
  0x10   : > { %317 = vmatpush.msra.mxu0 %v297_v3  ;;  %v292_v18 = vld [vmem:[%s644_s3 + $0x40] sm:$0xff]  ;;  %v302_v19 = vld [vmem:[%s644_s3 + $0x90] sm:$0xff]  ;;  %v291_v20 = vld [vmem:[%s644_s3 + $0x38] sm:$0xff] }
  0x11   : > { %v268_v12 = vadd.f32 %v479_v4, %v263_v9  ;;  %345 = vmatpush.msra.mxu1 %v305_v11  ;;  %v290_v21 = vld [vmem:[%s644_s3 + $0x30] sm:$0xff]  ;;  %v289_v22 = vld [vmem:[%s644_s3 + $0x28] sm:$0xff]  ;;  %v288_v23 = vld [vmem:[%s644_s3 + $0x20] sm:$0xff] }
  0x12   : > { %318 = vmatpush.msra.mxu0 %v296_v5  ;;  %v287_v24 = vld [vmem:[%s644_s3 + $0x18] sm:$0xff]  ;;  %v286_v25 = vld [vmem:[%s644_s3 + $0x10] sm:$0xff]  ;;  %v285_v26 = vld [vmem:[%s644_s3 + $0x8] sm:$0xff] }
  0x13   : > { %v269_v15 = vmax.f32 %v268_v12, 0.0  ;;  %346 = vmatpush.msra.mxu1 %v304_v14  ;;  %v284_v27 = vld [vmem:[%s644_s3] sm:$0xff]  ;;  %v301_v28 = vld [vmem:[%s644_s3 + $0x88] sm:$0xff] }
  0x14   : > { %319 = vmatpush.msra.mxu0 %v295_v10  ;;  %v300_v30 = vld [vmem:[%s644_s3 + $0x80] sm:$0xff] }
  0x15   : > { %279 = vrot.lane.b32.xlu0 %v269_v15, %s489_s10  ;;  %347 = vmatpush.msra.mxu1 %v303_v17  ;;  %v275_v29 = vrot.slane %v269_v15, 1  ;;  %v271_v32 = vrot.slane %v269_v15, 7  ;;  %v480_v36 = vld [vmem:[%s645_s4] ss:$0 sm:$0xff] }
  0x16   : > { %320 = vmatpush.msra.mxu0 %v294_v13 }
  0x17   : > { %348 = vmatpush.msra.mxu1 %v302_v19  ;;  %v278_v31 = vsel %vm277_vm0, %v275_v29, 0.0  ;;  %v274_v33 = vsel %vm273_vm2, 0.0, %v271_v32 }
  0x18   : > { %321 = vmatpush.msra.mxu0 %v293_v16 }
  0x19   : > { %349 = vmatpush.msra.mxu1 %v301_v28 }
  0x1a   : > { %322 = vmatpush.msra.mxu0 %v292_v18 }
  0x1b   : > { %350 = vmatpush.msra.mxu1 %v300_v30 }
  0x1c   : > { %323 = vmatpush.msra.mxu0 %v291_v20  ;;  %466 = vmatmul.msk.f32.vlgmr.msra.gmra.mxu1 %vm282_vm1, %v278_v31 }
  0x1e   : > { %324 = vmatpush.msra.mxu0 %v290_v21 }
  0x20   : > { %325 = vmatpush.msra.mxu0 %v289_v22 }
  0x22   : > { %326 = vmatpush.msra.mxu0 %v288_v23 }
  0x24   : > { %327 = vmatpush.msra.mxu0 %v287_v24 }
  0x26   : > { %328 = vmatpush.msra.mxu0 %v286_v25 }
  0x28   : > { %329 = vmatpush.msra.mxu0 %v285_v26 }
  0x2a   : > { %330 = vmatpush.msra.mxu0 %v284_v27 }
  0x87   : > { %v280_v34 = vpop.permute.xlu0 %279 }
  0x88   : > { %v283_v35 = vsel %vm282_vm1, %v274_v33, %v280_v34 }
  0x89   : > { %331 = vmatmul.f32.vlgmr.msra.gmra.mxu0 %v283_v35 }
  0x99   : > { %v352_v38 = vpop.f32.mrf.mxu1 }
 0x106   : > { %v332_v37 = vpop.f32.mrf.mxu0 }
 0x107   : > { %v333_v39 = vadd.f32 %v480_v36, %v332_v37 }
 0x109   : > { %v353_v40 = vadd.f32 %v352_v38, %v333_v39 }
 0x10b   : > { %355 = vst.msk [vmem:[%s253_s18] sm:$0xff] %vm282_vm1, %v353_v40  ;;  %v356_v41 = vsel %vm282_vm1, %v353_v40, 0.0  ;;  %v363_v42 = vmul.f32 %v353_v40, %v353_v40 }
 0x10c   : > { %v357_v43 = vrot.slane %v356_v41, 4 }
 0x10d   : > { %v364_v44 = vsel %vm282_vm1, %v363_v42, 0.0 }
 0x10e   : > { %v358_v45 = vadd.f32 %v357_v43, %v356_v41  ;;  %v365_v46 = vrot.slane %v364_v44, 4 }
 0x110   : > { %v359_v47 = vrot.slane %v358_v45, 2  ;;  %v366_v48 = vadd.f32 %v365_v46, %v364_v44 }
 0x112   : > { %v360_v49 = vadd.f32 %v359_v47, %v358_v45  ;;  %v367_v50 = vrot.slane %v366_v48, 2 }
 0x114   : > { %v361_v51 = vrot.slane %v360_v49, 1  ;;  %v368_v52 = vadd.f32 %v367_v50, %v366_v48 }
 0x116   : > { %v369_v53 = vrot.slane %v368_v52, 1  ;;  %v362_v54 = vadd.f32 %v361_v51, %v360_v49 }
 0x118   : > { %v370_v55 = vadd.f32 %v369_v53, %v368_v52 }
 0x11a   : > { %v371_v56 = vsel %vm273_vm2, %v362_v54, %v370_v55 }
 0x11b   : > { %373 = vst.msk [vmem:[%s257_s23] sm:$0x3] %vm372_vm3, %v371_v56 }
 0x11c PF: > { %s17_s21 = sadd.s32 1, %s487_s21  }
 0x11d   : > { %p14_p4 = scmp.ge.s32.totalorder %s17_s21, 4  }
 0x11f   :  { %16 = sbr.rel (!%p14_p4) target bundleno = 1 (0x1), region = 82 }

// kernel: rescnn_forward.13
= control target key start
LH: loop header
LB: loop body
LE: loop exit
PB: predicated region body
PF: predicated region fallthrough
CT: control target
= control target key end

     0   :  { %s172_s0 = inlined_call_operand.vmem [shape: f32[8,256], index: 0, kind: input, shape index: {}]   ;;  %s173_s1 = inlined_call_operand.vmem [shape: f32[1,256], index: 1, kind: input, shape index: {}]   ;;  %s174_s2 = inlined_call_operand.vmem [shape: f32[1,256], index: 2, kind: input, shape index: {}]   ;;  %s175_s3 = inlined_call_operand.vmem [shape: f32[8,256], index: 3, kind: input, shape index: {}]   ;;  %s176_s4 = inlined_call_operand.vmem [shape: f32[1,256], index: 4, kind: input, shape index: {}]   ;;  %s177_s5 = inlined_call_operand.vmem [shape: f32[1,256], index: 5, kind: input, shape index: {}]   ;;  %s178_s6 = inlined_call_operand.hbm [shape: f32[8,128], index: 6, kind: output, shape index: {}]  }
   0x1   :  { %v24_v0 = vld [vmem:[%s172_s0] sm:$0xff]  ;;  %v25_v1 = vld [vmem:[%s172_s0 + $0x8] sm:$0xff] }
   0x2   :  { %v26_v2 = vld [vmem:[%s173_s1] sm:$0x3]  ;;  %v43_v7 = vld [vmem:[%s175_s3 + $0x8] sm:$0xff] }
   0x3   :  { %v28_v3 = vperm.slane %v26_v2, 0  ;;  %v29_v4 = vperm.slane %v26_v2, 1  ;;  %v34_v5 = vld [vmem:[%s174_s2] sm:$0x3] }
   0x4   :  { %v42_v6 = vld [vmem:[%s175_s3] sm:$0xff]  ;;  %v36_v8 = vperm.slane %v34_v5, 0  ;;  %v37_v9 = vperm.slane %v34_v5, 1 }
   0x5   :  { %v44_v10 = vld [vmem:[%s176_s4] sm:$0x3]  ;;  %v32_v12 = vmul.f32 %v28_v3, %v24_v0  ;;  %v33_v13 = vmul.f32 %v29_v4, %v25_v1 }
   0x6   :  { %v54_v11 = vld [vmem:[%s177_s5] sm:$0x3]  ;;  %v46_v14 = vperm.slane %v44_v10, 0  ;;  %v47_v15 = vperm.slane %v44_v10, 1 }
   0x7   :  { %11 = vsyncpa [#allocation3], 0  ;;  %v56_v16 = vperm.slane %v54_v11, 0  ;;  %v57_v17 = vperm.slane %v54_v11, 1  ;;  %v40_v18 = vadd.f32 %v36_v8, %v32_v12  ;;  %v41_v19 = vadd.f32 %v37_v9, %v33_v13  ;;  %s109_s2 = smov [#allocation2]   ;;  %s73_s5 = sshll.u32 %s178_s6, 4  ;;  %s74_s5 = int_to_ptr.hbm [resolvable:$true] %s73_s5 }
   0x8   :  { %v50_v20 = vmul.f32 %v46_v14, %v42_v6  ;;  %v51_v21 = vmul.f32 %v47_v15, %v43_v7  ;;  %s71_s3 = sshll.u32 %s109_s2, 4  ;;  %s72_s3 = int_to_ptr.vmem [resolvable:$true] %s71_s3 }
   0xa   :  { %v52_v22 = vadd.f32 %v50_v20, %v40_v18  ;;  %v53_v23 = vadd.f32 %v51_v21, %v41_v19 }
   0xc   :  { %v60_v24 = vadd.f32 %v56_v16, %v52_v22  ;;  %v61_v25 = vadd.f32 %v57_v17, %v53_v23 }
   0xe   :  { %v62_v26 = vmax.f32 %v60_v24, 0.0  ;;  %v63_v27 = vmax.f32 %v61_v25, 0.0 }
  0x10   :  { %v64_v28 = vmax.f32 %v62_v26, %v63_v27 }
  0x12   :  { %65 = vst [vmem:[#allocation2] sm:$0xff] %v64_v28 }
  0x13   :  { %76 = dma.vmem_to_hbm [thread:$0]  %s72_s3, 128, %s74_s5, [#allocation3]  }
  0x14   :  { %107 = dma.done.wait [#allocation3], 128  }
  0x15   :  { %108 = vsyncadd [#allocation3], 4294967168 }
  0x16   :  { %81 = vsyncpa [#allocation3], 1 }

// kernel: rescnn_forward.11
= control target key start
LH: loop header
LB: loop body
LE: loop exit
PB: predicated region body
PF: predicated region fallthrough
CT: control target
= control target key end

     0   :  { %14 = vsyncpa [#allocation3], 0  ;;  %s834_s27 = smov 0   ;;  %s890_s0 = inlined_call_operand.vmem [shape: f32[2,8,64], index: 0, kind: input, shape index: {}]   ;;  %s891_s1 = inlined_call_operand.vmem [shape: f32[1,64], index: 1, kind: input, shape index: {}]   ;;  %s892_s2 = inlined_call_operand.vmem [shape: f32[1,64], index: 2, kind: input, shape index: {}]   ;;  %s893_s3 = inlined_call_operand.vmem [shape: f32[2,8,64], index: 3, kind: input, shape index: {}]   ;;  %s894_s4 = inlined_call_operand.hbm [shape: f32[192,256], index: 4, kind: input, shape index: {}]   ;;  %s895_s5 = inlined_call_operand.vmem [shape: f32[1,256], index: 5, kind: input, shape index: {}]   ;;  %s896_s6 = inlined_call_operand.vmem [shape: f32[2,8,128], index: 6, kind: output, shape index: {0}]   ;;  %s897_s7 = inlined_call_operand.vmem [shape: f32[2,8,128], index: 7, kind: output, shape index: {1}]   ;;  %s898_s8 = inlined_call_operand.vmem [shape: f32[2,2,256], index: 8, kind: output, shape index: {2}]  }
   0x1 LB: > { %s256_s30 = sshll.u32 %s894_s4, 4  ;;  %s701_s9 = sadd.s32 4294967295, %s783_s27   ;;  %s783_s27 = sphi %s834_s27, %s20_s27   ;;  %s257_s30 = int_to_ptr.hbm [resolvable:$true] %s256_s30 }
   0x2   : > { %p703_p0 = scmp.ge.s32.totalorder %s783_s27, 1  ;;  %p239_p1 = scmp.lt.s32.totalorder %s783_s27, 3 }
   0x3   : > { %p727_p2 = scmp.eq.s32.totalorder %s701_s9, 0  ;;  %s785_s10 = smov [#allocation2]  }
   0x4   : > { %p240_p3 = pnand %p703_p0, %p239_p1  ;;  %s258_s11 = sshll.u32 %s785_s10, 4  ;;  %s259_s11 = int_to_ptr.vmem [resolvable:$true] %s258_s11 }
   0x5   : > { %s786_s12 = smov 256   ;;  %s787_s13 = smov 16  }
   0x6   : > { %p723_p4 = pneg %p240_p3  ;;  %291 = sbr.rel (%p240_p3) target bundleno = 297 (0x129), region = 44 }
   0x8   : > { %p724_p5 = pnand %p727_p2, %p723_p4 }
   0xa   : > { %726 = dma.hbm_to_vmem [thread:$0]  (!%p724_p5), %s257_s30, 6144, %s259_s11, [#allocation3], %s786_s12, %s786_s12, %s787_s13  }
   0xb   : > { %778 = dma.done.wait (%p727_p2), [#allocation3], 6144  }
   0xc   : > { %780 = vsyncadd (%p727_p2), [#allocation3], 4294961152  ;;  %p337_p6 = scmp.lt.s32.totalorder %s701_s9, 1  ;;  %v741_v1 = vld [vmem:[%s891_s1] ss:$0 sm:$0xff]  ;;  %v416_v4 = vld [vmem:[#allocation2 + $0xf0] sm:$0xff] }
   0xd   : > { %v742_v2 = vld [vmem:[%s892_s2] ss:$0 sm:$0xff]  ;;  %v417_v5 = vld [vmem:[#allocation2 + $0xf8] sm:$0xff]  ;;  %443 = vmatpush.msra.mxu0 %v416_v4  ;;  %v415_v8 = vld [vmem:[#allocation2 + $0xe8] sm:$0xff]  ;;  %s788_s25 = smov 64   ;;  %vm379_vm0 = vcmask 1046528  }
   0xe   : > { %s900_s9 = smov (!%p337_p6, %s701_s9), 1  ;;  %v414_v6 = vld [vmem:[#allocation2 + $0xe0] sm:$0xff]  ;;  %483 = vmatpush.msra.mxu2 %v417_v5  ;;  %v412_v10 = vld [vmem:[#allocation2 + $0xd0] sm:$0xff]  ;;  %v413_v11 = vld [vmem:[#allocation2 + $0xd8] sm:$0xff]  ;;  %vm384_vm1 = vcmask 523264   ;;  %vm375_vm2 = vcmask 1040384  }
   0xf   : > { %s848_s14 = sshll.u32 %s900_s9, 3  ;;  %444 = vmatpush.msra.mxu0 %v414_v6  ;;  %v410_v13 = vld [vmem:[#allocation2 + $0xc0] sm:$0xff]  ;;  %v411_v14 = vld [vmem:[#allocation2 + $0xc8] sm:$0xff]  ;;  %v408_v16 = vld [vmem:[#allocation2 + $0xb0] sm:$0xff]  ;;  %vm556_vm3 = vcmask 1041408  }
  0x10   : > { %s340_s17 = scalar_lea.vmem %s890_s0, %s848_s14  ;;  %s344_s20 = scalar_lea.vmem %s893_s3, %s848_s14  ;;  %484 = vmatpush.msra.mxu2 %v415_v8  ;;  %v409_v17 = vld [vmem:[#allocation2 + $0xb8] sm:$0xff]  ;;  %v432_v18 = vld [vmem:[#allocation2 + $0x170] sm:$0xff]  ;;  %v430_v20 = vld [vmem:[#allocation2 + $0x160] sm:$0xff] }
  0x11   : > { %v358_v0 = vld [vmem:[%s340_s17] sm:$0xff]  ;;  %445 = vmatpush.msra.mxu0 %v412_v10  ;;  %v433_v19 = vld [vmem:[#allocation2 + $0x178] sm:$0xff]  ;;  %v407_v22 = vld [vmem:[#allocation2 + $0xa8] sm:$0xff]  ;;  %471 = vmatpush.msra.mxu1 %v432_v18  ;;  %s348_s10 = scalar_lea.vmem %s896_s6, %s848_s14  ;;  %s352_s13 = scalar_lea.vmem %s897_s7, %s848_s14 }
  0x12   : > { %v363_v3 = vmul.f32 %v741_v1, %v358_v0  ;;  %v369_v7 = vld [vmem:[%s344_s20] sm:$0xff]  ;;  %485 = vmatpush.msra.mxu2 %v413_v11  ;;  %v431_v23 = vld [vmem:[#allocation2 + $0x168] sm:$0xff]  ;;  %v428_v24 = vld [vmem:[#allocation2 + $0x150] sm:$0xff]  ;;  %511 = vmatpush.msra.mxu3 %v433_v19  ;;  %s718_s14 = sshll.u32 %s900_s9, 2 }
  0x13   : > { %446 = vmatpush.msra.mxu0 %v410_v13  ;;  %v406_v21 = vld [vmem:[#allocation2 + $0xa0] sm:$0xff]  ;;  %v404_v25 = vld [vmem:[#allocation2 + $0x90] sm:$0xff]  ;;  %v405_v26 = vld [vmem:[#allocation2 + $0x98] sm:$0xff]  ;;  %472 = vmatpush.msra.mxu1 %v430_v20  ;;  %s357_s17 = scalar_lea.vmem %s898_s8, %s718_s14 }
  0x14   : > { %v368_v9 = vadd.f32 %v742_v2, %v363_v3  ;;  %486 = vmatpush.msra.mxu2 %v411_v14  ;;  %v429_v27 = vld [vmem:[#allocation2 + $0x158] sm:$0xff]  ;;  %v426_v28 = vld [vmem:[#allocation2 + $0x140] sm:$0xff]  ;;  %v403_v30 = vld [vmem:[#allocation2 + $0x88] sm:$0xff]  ;;  %512 = vmatpush.msra.mxu3 %v431_v23 }
  0x15   : > { %447 = vmatpush.msra.mxu0 %v408_v16  ;;  %v402_v29 = vld [vmem:[#allocation2 + $0x80] sm:$0xff]  ;;  %473 = vmatpush.msra.mxu1 %v428_v24  ;;  %v427_v31 = vld [vmem:[#allocation2 + $0x148] sm:$0xff]  ;;  %v424_v32 = vld [vmem:[#allocation2 + $0x130] sm:$0xff] }
  0x16   : > { %v370_v12 = vadd.f32 %v369_v7, %v368_v9  ;;  %487 = vmatpush.msra.mxu2 %v409_v17  ;;  %v400_v33 = vld [vmem:[#allocation2 + $0x70] sm:$0xff]  ;;  %v401_v34 = vld [vmem:[#allocation2 + $0x78] sm:$0xff]  ;;  %513 = vmatpush.msra.mxu3 %v429_v27  ;;  %v422_v36 = vld [vmem:[#allocation2 + $0x120] sm:$0xff] }
  0x17   : > { %448 = vmatpush.msra.mxu0 %v406_v21  ;;  %474 = vmatpush.msra.mxu1 %v426_v28  ;;  %v425_v35 = vld [vmem:[#allocation2 + $0x138] sm:$0xff]  ;;  %v398_v37 = vld [vmem:[#allocation2 + $0x60] sm:$0xff]  ;;  %v399_v38 = vld [vmem:[#allocation2 + $0x68] sm:$0xff] }
  0x18   : > { %v864_v15 = vmax.f32 %v370_v12, 0.0  ;;  %488 = vmatpush.msra.mxu2 %v407_v22  ;;  %514 = vmatpush.msra.mxu3 %v427_v31  ;;  %v423_v39 = vld [vmem:[#allocation2 + $0x128] sm:$0xff]  ;;  %v396_v40 = vld [vmem:[#allocation2 + $0x50] sm:$0xff]  ;;  %v397_v41 = vld [vmem:[#allocation2 + $0x58] sm:$0xff] }
  0x19   : > { %449 = vmatpush.msra.mxu0 %v404_v25  ;;  %475 = vmatpush.msra.mxu1 %v424_v32  ;;  %v394_v42 = vld [vmem:[#allocation2 + $0x40] sm:$0xff]  ;;  %v395_v43 = vld [vmem:[#allocation2 + $0x48] sm:$0xff]  ;;  %v392_v44 = vld [vmem:[#allocation2 + $0x30] sm:$0xff] }
  0x1a   : > { %381 = vrot.lane.b32.xlu0 %v864_v15, %s788_s25  ;;  %489 = vmatpush.msra.mxu2 %v405_v26  ;;  %v393_v45 = vld [vmem:[#allocation2 + $0x38] sm:$0xff]  ;;  %v390_v46 = vld [vmem:[#allocation2 + $0x20] sm:$0xff]  ;;  %v391_v47 = vld [vmem:[#allocation2 + $0x28] sm:$0xff]  ;;  %v377_v54 = vrot.slane %v864_v15, 1  ;;  %v373_v58 = vrot.slane %v864_v15, 7 }
  0x1b   : > { %450 = vmatpush.msra.mxu0 %v402_v29  ;;  %515 = vmatpush.msra.mxu3 %v425_v35  ;;  %v388_v48 = vld [vmem:[#allocation2 + $0x10] sm:$0xff]  ;;  %v389_v49 = vld [vmem:[#allocation2 + $0x18] sm:$0xff]  ;;  %v386_v50 = vld [vmem:[#allocation2] sm:$0xff] }
  0x1c   : > { %490 = vmatpush.msra.mxu2 %v403_v30  ;;  %476 = vmatpush.msra.mxu1 %v422_v36  ;;  %v420_v51 = vld [vmem:[#allocation2 + $0x110] sm:$0xff]  ;;  %v387_v52 = vld [vmem:[#allocation2 + $0x8] sm:$0xff]  ;;  %v421_v53 = vld [vmem:[#allocation2 + $0x118] sm:$0xff]  ;;  %v380_v57 = vsel %vm379_vm0, %v377_v54, 0.0  ;;  %v376_v59 = vsel %vm375_vm2, 0.0, %v373_v58 }
  0x1d   : > { %451 = vmatpush.msra.mxu0 %v400_v33  ;;  %516 = vmatpush.msra.mxu3 %v423_v39  ;;  %v418_v55 = vld [vmem:[#allocation2 + $0x100] sm:$0xff]  ;;  %v419_v56 = vld [vmem:[#allocation2 + $0x108] sm:$0xff] }
  0x1e   : > { %491 = vmatpush.msra.mxu2 %v401_v34  ;;  %477 = vmatpush.msra.mxu1 %v420_v51  ;;  %v434_v62 = vld [vmem:[%s895_s5] sm:$0x3] }
  0x1f   : > { %452 = vmatpush.msra.mxu0 %v398_v37  ;;  %517 = vmatpush.msra.mxu3 %v421_v53  ;;  %v436_v63 = vperm.slane %v434_v62, 0  ;;  %v437_v4 = vperm.slane %v434_v62, 1 }
  0x20   : > { %492 = vmatpush.msra.mxu2 %v399_v38  ;;  %478 = vmatpush.msra.mxu1 %v418_v55 }
  0x21   : > { %453 = vmatpush.msra.mxu0 %v396_v40  ;;  %518 = vmatpush.msra.mxu3 %v419_v56 }
  0x22   : > { %493 = vmatpush.msra.mxu2 %v397_v41  ;;  %714 = vmatmul.msk.f32.vlgmr.msra.gmra.mxu1 %vm384_vm1, %v380_v57 }
  0x23   : > { %454 = vmatpush.msra.mxu0 %v394_v42  ;;  %715 = vmatmul.msk.f32.vlgmr.msra.gmra.mxu3 %vm384_vm1, %v380_v57 }
  0x24   : > { %494 = vmatpush.msra.mxu2 %v395_v43 }
  0x25   : > { %455 = vmatpush.msra.mxu0 %v392_v44 }
  0x26   : > { %495 = vmatpush.msra.mxu2 %v393_v45 }
  0x27   : > { %456 = vmatpush.msra.mxu0 %v390_v46 }
  0x28   : > { %496 = vmatpush.msra.mxu2 %v391_v47 }
  0x29   : > { %457 = vmatpush.msra.mxu0 %v388_v48 }
  0x2a   : > { %497 = vmatpush.msra.mxu2 %v389_v49 }
  0x2b   : > { %458 = vmatpush.msra.mxu0 %v386_v50 }
  0x2c   : > { %498 = vmatpush.msra.mxu2 %v387_v52 }
  0x8c   : > { %v382_v60 = vpop.permute.xlu0 %381 }
  0x8d   : > { %v385_v61 = vsel %vm384_vm1, %v376_v59, %v382_v60 }
  0x8e   : > { %459 = vmatmul.f32.vlgmr.msra.gmra.mxu0 %v385_v61  ;;  %499 = vmatmul.f32.vlgmr.msra.gmra.mxu2 %v385_v61 }
  0x9f   : > { %v480_v1 = vpop.f32.mrf.mxu1 }
  0xa6   : > { %v520_v8 = vpop.f32.mrf.mxu3 }
 0x10b   : > { %v460_v0 = vpop.f32.mrf.mxu0 }
 0x10c   : > { %v461_v2 = vadd.f32 %v460_v0, %v436_v63 }
 0x10e   : > { %v481_v3 = vadd.f32 %v480_v1, %v461_v2 }
 0x110   : > { %523 = vst [vmem:[%s348_s10] sm:$0xff] %v481_v3  ;;  %v525_v5 = vrot.slane %v481_v3, 4  ;;  %v537_v6 = vmul.f32 %v481_v3, %v481_v3 }
 0x111   : > { %v500_v7 = vpop.f32.mrf.mxu2 }
 0x112   : > { %v539_v9 = vrot.slane %v537_v6, 4  ;;  %v501_v10 = vadd.f32 %v500_v7, %v437_v4  ;;  %v526_v11 = vadd.f32 %v525_v5, %v481_v3 }
 0x114   : > { %v540_v12 = vadd.f32 %v539_v9, %v537_v6  ;;  %v521_v13 = vadd.f32 %v520_v8, %v501_v10  ;;  %v527_v17 = vrot.slane %v526_v11, 2 }
 0x116   : > { %v541_v14 = vrot.slane %v540_v12, 2  ;;  %524 = vst [vmem:[%s352_s13] sm:$0xff] %v521_v13  ;;  %v531_v15 = vrot.slane %v521_v13, 4  ;;  %v538_v16 = vmul.f32 %v521_v13, %v521_v13  ;;  %v528_v23 = vadd.f32 %v527_v17, %v526_v11 }
 0x118   : > { %v532_v18 = vadd.f32 %v531_v15, %v521_v13  ;;  %v545_v19 = vrot.slane %v538_v16, 4  ;;  %v542_v20 = vadd.f32 %v541_v14, %v540_v12  ;;  %v529_v29 = vrot.slane %v528_v23, 1 }
 0x11a   : > { %v533_v21 = vrot.slane %v532_v18, 2  ;;  %v546_v22 = vadd.f32 %v545_v19, %v538_v16  ;;  %v543_v26 = vrot.slane %v542_v20, 1  ;;  %v530_v34 = vadd.f32 %v529_v29, %v528_v23 }
 0x11c   : > { %v534_v24 = vadd.f32 %v533_v21, %v532_v18  ;;  %v547_v25 = vrot.slane %v546_v22, 2  ;;  %v544_v31 = vadd.f32 %v543_v26, %v542_v20 }
 0x11e   : > { %v535_v27 = vrot.slane %v534_v24, 1  ;;  %v548_v28 = vadd.f32 %v547_v25, %v546_v22  ;;  %v551_v37 = vsel %vm375_vm2, %v530_v34, %v544_v31 }
 0x120   : > { %v549_v30 = vrot.slane %v548_v28, 1  ;;  %v536_v32 = vadd.f32 %v535_v27, %v534_v24 }
 0x122   : > { %v550_v33 = vadd.f32 %v549_v30, %v548_v28 }
 0x124   : > { %v552_v35 = vsel %vm375_vm2, %v536_v32, %v550_v33 }
 0x125   : > { %v555_v36 = vrot.slane %v552_v35, 6 }
 0x127   : > { %v557_v38 = vsel %vm556_vm3, %v551_v37, %v555_v36 }
 0x128   : > { %559 = vst [vmem:[%s357_s17] sm:$0xf] %v557_v38 }
 0x129 PF: > { %s20_s27 = sadd.s32 1, %s783_s27  }
 0x12a   : > { %p17_p7 = scmp.ge.s32.totalorder %s20_s27, 4  }
 0x12c   :  { %19 = sbr.rel (!%p17_p7) target bundleno = 1 (0x1), region = 106 }
 0x131   :  { %609 = vsyncpa [#allocation3], 1 }
 0x132   :  { %611 = vsyncpa [#allocation3 + $0x1], 1 }

// kernel: rescnn_forward.12
= control target key start
LH: loop header
LB: loop body
LE: loop exit
PB: predicated region body
PF: predicated region fallthrough
CT: control target
= control target key end

     0   :  { %12 = vsyncpa [#allocation3], 0  ;;  %s639_s21 = smov 0   ;;  %s688_s0 = inlined_call_operand.vmem [shape: f32[2,8,128], index: 0, kind: input, shape index: {}]   ;;  %s689_s1 = inlined_call_operand.vmem [shape: f32[1,128], index: 1, kind: input, shape index: {}]   ;;  %s690_s2 = inlined_call_operand.vmem [shape: f32[1,128], index: 2, kind: input, shape index: {}]   ;;  %s691_s3 = inlined_call_operand.hbm [shape: f32[384,128], index: 3, kind: input, shape index: {}]   ;;  %s692_s4 = inlined_call_operand.vmem [shape: f32[1,128], index: 4, kind: input, shape index: {}]   ;;  %s693_s5 = inlined_call_operand.vmem [shape: f32[2,8,128], index: 5, kind: output, shape index: {0}]   ;;  %s694_s6 = inlined_call_operand.vmem [shape: f32[2,2,128], index: 6, kind: output, shape index: {1}]  }
   0x1 LB: > { %s202_s24 = sshll.u32 %s691_s3, 4  ;;  %s648_s25 = sadd.s32 4294967295, %s599_s21   ;;  %s599_s21 = sphi %s639_s21, %s18_s21   ;;  %s203_s24 = int_to_ptr.hbm [resolvable:$true] %s202_s24 }
   0x2   : > { %p522_p0 = scmp.ge.s32.totalorder %s599_s21, 1  ;;  %p185_p1 = scmp.lt.s32.totalorder %s599_s21, 3 }
   0x3   : > { %p543_p2 = scmp.eq.s32.totalorder %s648_s25, 0  ;;  %s601_s26 = smov [#allocation2]  }
   0x4   : > { %p186_p3 = pnand %p522_p0, %p185_p1  ;;  %s204_s27 = sshll.u32 %s601_s26, 4  ;;  %s205_s27 = int_to_ptr.vmem [resolvable:$true] %s204_s27 }
   0x5   : > { %s602_s28 = smov 128   ;;  %s603_s29 = smov 8  }
   0x6   : > { %p539_p4 = pneg %p186_p3  ;;  %230 = sbr.rel (%p186_p3) target bundleno = 194 (0xc2), region = 40 }
   0x8   : > { %p540_p5 = pnand %p543_p2, %p539_p4 }
   0xa   : > { %542 = dma.hbm_to_vmem [thread:$0]  (!%p540_p5), %s203_s24, 6144, %s205_s27, [#allocation3], %s602_s28, %s602_s28, %s603_s29  }
   0xb   : > { %594 = dma.done.wait (%p543_p2), [#allocation3], 6144  }
   0xc   : > { %596 = vsyncadd (%p543_p2), [#allocation3], 4294961152  ;;  %v343_v0 = vld [vmem:[#allocation2 + $0x178] sm:$0xff]  ;;  %v342_v2 = vld [vmem:[#allocation2 + $0x170] sm:$0xff]  ;;  %p263_p6 = scmp.lt.s32.totalorder %s648_s25, 1  ;;  %vm290_vm0 = vcmask 1040384  }
   0xd   : > { %v311_v1 = vld [vmem:[#allocation2 + $0x78] sm:$0xff]  ;;  %388 = vmatpush.msra.mxu2 %v343_v0  ;;  %v310_v3 = vld [vmem:[#allocation2 + $0x70] sm:$0xff]  ;;  %v341_v5 = vld [vmem:[#allocation2 + $0x168] sm:$0xff]  ;;  %vm294_vm1 = vcmask 1046528  }
   0xe   : > { %348 = vmatpush.msra.mxu0 %v311_v1  ;;  %v327_v4 = vld [vmem:[#allocation2 + $0xf8] sm:$0xff]  ;;  %v309_v6 = vld [vmem:[#allocation2 + $0x68] sm:$0xff]  ;;  %v326_v7 = vld [vmem:[#allocation2 + $0xf0] sm:$0xff]  ;;  %s696_s25 = smov (!%p263_p6, %s648_s25), 1 }
   0xf   : > { %368 = vmatpush.msra.mxu1 %v327_v4  ;;  %389 = vmatpush.msra.mxu2 %v342_v2  ;;  %v325_v8 = vld [vmem:[#allocation2 + $0xe8] sm:$0xff]  ;;  %v340_v9 = vld [vmem:[#allocation2 + $0x160] sm:$0xff]  ;;  %v339_v12 = vld [vmem:[#allocation2 + $0x158] sm:$0xff]  ;;  %s527_s30 = sshll.u32 %s696_s25, 3  ;;  %s529_s19 = sshll.u32 %s696_s25, 1 }
  0x10   : > { %349 = vmatpush.msra.mxu0 %v310_v3  ;;  %v308_v10 = vld [vmem:[#allocation2 + $0x60] sm:$0xff]  ;;  %v307_v13 = vld [vmem:[#allocation2 + $0x58] sm:$0xff]  ;;  %v338_v15 = vld [vmem:[#allocation2 + $0x150] sm:$0xff]  ;;  %s266_s9 = scalar_lea.vmem %s688_s0, %s527_s30  ;;  %s270_s18 = scalar_lea.vmem %s693_s5, %s527_s30 }
  0x11   : > { %369 = vmatpush.msra.mxu1 %v326_v7  ;;  %390 = vmatpush.msra.mxu2 %v341_v5  ;;  %v324_v11 = vld [vmem:[#allocation2 + $0xe0] sm:$0xff]  ;;  %v323_v14 = vld [vmem:[#allocation2 + $0xd8] sm:$0xff]  ;;  %v306_v16 = vld [vmem:[#allocation2 + $0x50] sm:$0xff]  ;;  %s274_s23 = scalar_lea.vmem %s694_s6, %s529_s19 }
  0x12   : > { %350 = vmatpush.msra.mxu0 %v309_v6  ;;  %v322_v17 = vld [vmem:[#allocation2 + $0xd0] sm:$0xff]  ;;  %v337_v18 = vld [vmem:[#allocation2 + $0x148] sm:$0xff]  ;;  %v336_v21 = vld [vmem:[#allocation2 + $0x140] sm:$0xff] }
  0x13   : > { %370 = vmatpush.msra.mxu1 %v325_v8  ;;  %391 = vmatpush.msra.mxu2 %v340_v9  ;;  %v305_v19 = vld [vmem:[#allocation2 + $0x48] sm:$0xff]  ;;  %v304_v22 = vld [vmem:[#allocation2 + $0x40] sm:$0xff]  ;;  %v335_v23 = vld [vmem:[#allocation2 + $0x138] sm:$0xff] }
  0x14   : > { %351 = vmatpush.msra.mxu0 %v308_v10  ;;  %v321_v20 = vld [vmem:[#allocation2 + $0xc8] sm:$0xff]  ;;  %v320_v24 = vld [vmem:[#allocation2 + $0xc0] sm:$0xff]  ;;  %v303_v25 = vld [vmem:[#allocation2 + $0x38] sm:$0xff] }
  0x15   : > { %371 = vmatpush.msra.mxu1 %v324_v11  ;;  %392 = vmatpush.msra.mxu2 %v339_v12  ;;  %v334_v26 = vld [vmem:[#allocation2 + $0x130] sm:$0xff]  ;;  %v319_v27 = vld [vmem:[#allocation2 + $0xb8] sm:$0xff]  ;;  %v275_v28 = vld [vmem:[%s266_s9] sm:$0xff] }
  0x16   : > { %352 = vmatpush.msra.mxu0 %v307_v13  ;;  %v556_v29 = vld [vmem:[%s689_s1] ss:$0 sm:$0xff]  ;;  %v302_v30 = vld [vmem:[#allocation2 + $0x30] sm:$0xff]  ;;  %v333_v34 = vld [vmem:[#allocation2 + $0x128] sm:$0xff] }
  0x17   : > { %372 = vmatpush.msra.mxu1 %v323_v14  ;;  %393 = vmatpush.msra.mxu2 %v338_v15  ;;  %v557_v31 = vld [vmem:[%s690_s2] ss:$0 sm:$0xff]  ;;  %v318_v32 = vld [vmem:[#allocation2 + $0xb0] sm:$0xff]  ;;  %v280_v33 = vmul.f32 %v556_v29, %v275_v28  ;;  %v301_v35 = vld [vmem:[#allocation2 + $0x28] sm:$0xff] }
  0x18   : > { %353 = vmatpush.msra.mxu0 %v306_v16  ;;  %v317_v36 = vld [vmem:[#allocation2 + $0xa8] sm:$0xff]  ;;  %v332_v37 = vld [vmem:[#allocation2 + $0x120] sm:$0xff]  ;;  %v331_v41 = vld [vmem:[#allocation2 + $0x118] sm:$0xff] }
  0x19   : > { %373 = vmatpush.msra.mxu1 %v322_v17  ;;  %394 = vmatpush.msra.mxu2 %v337_v18  ;;  %v300_v38 = vld [vmem:[#allocation2 + $0x20] sm:$0xff]  ;;  %v285_v39 = vadd.f32 %v557_v31, %v280_v33  ;;  %v299_v42 = vld [vmem:[#allocation2 + $0x18] sm:$0xff]  ;;  %v330_v44 = vld [vmem:[#allocation2 + $0x110] sm:$0xff] }
  0x1a   : > { %354 = vmatpush.msra.mxu0 %v305_v19  ;;  %v316_v40 = vld [vmem:[#allocation2 + $0xa0] sm:$0xff]  ;;  %v315_v43 = vld [vmem:[#allocation2 + $0x98] sm:$0xff]  ;;  %v298_v45 = vld [vmem:[#allocation2 + $0x10] sm:$0xff] }
  0x1b   : > { %374 = vmatpush.msra.mxu1 %v321_v20  ;;  %395 = vmatpush.msra.mxu2 %v336_v21  ;;  %v286_v46 = vmax.f32 %v285_v39, 0.0  ;;  %v314_v47 = vld [vmem:[#allocation2 + $0x90] sm:$0xff]  ;;  %v329_v48 = vld [vmem:[#allocation2 + $0x108] sm:$0xff]  ;;  %v328_v51 = vld [vmem:[#allocation2 + $0x100] sm:$0xff] }
  0x1c   : > { %355 = vmatpush.msra.mxu0 %v304_v22  ;;  %v297_v49 = vld [vmem:[#allocation2 + $0x8] sm:$0xff]  ;;  %v296_v53 = vld [vmem:[#allocation2] sm:$0xff]  ;;  %vm530_vm2 = vmneg %vm290_vm0 }
  0x1d   : > { %375 = vmatpush.msra.mxu1 %v320_v24  ;;  %396 = vmatpush.msra.mxu2 %v335_v23  ;;  %v313_v50 = vld [vmem:[#allocation2 + $0x88] sm:$0xff]  ;;  %v292_v52 = vrot.slane %v286_v46, 1  ;;  %v288_v54 = vrot.slane %v286_v46, 7  ;;  %v312_v55 = vld [vmem:[#allocation2 + $0x80] sm:$0xff] }
  0x1e   : > { %356 = vmatpush.msra.mxu0 %v303_v25  ;;  %v558_v56 = vld [vmem:[%s692_s4] ss:$0 sm:$0xff] }
  0x1f   : > { %376 = vmatpush.msra.mxu1 %v319_v27  ;;  %397 = vmatpush.msra.mxu2 %v334_v26 }
  0x20   : > { %357 = vmatpush.msra.mxu0 %v302_v30 }
  0x21   : > { %377 = vmatpush.msra.mxu1 %v318_v32  ;;  %398 = vmatpush.msra.mxu2 %v333_v34 }
  0x22   : > { %358 = vmatpush.msra.mxu0 %v301_v35 }
  0x23   : > { %378 = vmatpush.msra.mxu1 %v317_v36  ;;  %399 = vmatpush.msra.mxu2 %v332_v37 }
  0x24   : > { %359 = vmatpush.msra.mxu0 %v300_v38 }
  0x25   : > { %379 = vmatpush.msra.mxu1 %v316_v40  ;;  %400 = vmatpush.msra.mxu2 %v331_v41 }
  0x26   : > { %360 = vmatpush.msra.mxu0 %v299_v42 }
  0x27   : > { %380 = vmatpush.msra.mxu1 %v315_v43  ;;  %401 = vmatpush.msra.mxu2 %v330_v44 }
  0x28   : > { %361 = vmatpush.msra.mxu0 %v298_v45 }
  0x29   : > { %381 = vmatpush.msra.mxu1 %v314_v47  ;;  %402 = vmatpush.msra.mxu2 %v329_v48 }
  0x2a   : > { %362 = vmatpush.msra.mxu0 %v297_v49 }
  0x2b   : > { %382 = vmatpush.msra.mxu1 %v313_v50  ;;  %403 = vmatpush.msra.mxu2 %v328_v51 }
  0x2c   : > { %363 = vmatpush.msra.mxu0 %v296_v53  ;;  %532 = vmatmul.msk.f32.vlgmr.msra.gmra.mxu2 %vm294_vm1, %v292_v52 }
  0x2d   : > { %531 = vmatmul.msk.f32.vlgmr.msra.gmra.mxu0 %vm530_vm2, %v288_v54  ;;  %383 = vmatpush.msra.mxu1 %v312_v55 }
  0x2e   : > { %384 = vmatmul.f32.vlgmr.msra.gmra.mxu1 %v286_v46 }
  0xaa   : > { %v365_v57 = vpop.f32.mrf.mxu0 }
  0xab   : > { %v366_v58 = vadd.f32 %v558_v56, %v365_v57  ;;  %v385_v59 = vpop.f32.mrf.mxu1 }
  0xad   : > { %v386_v60 = vadd.f32 %v385_v59, %v366_v58 }
  0xaf   : > { %v405_v61 = vpop.f32.mrf.mxu2 }
  0xb0   : > { %v406_v62 = vadd.f32 %v405_v61, %v386_v60 }
  0xb2   : > { %408 = vst [vmem:[%s270_s18] sm:$0xff] %v406_v62  ;;  %v409_v63 = vrot.slane %v406_v62, 4  ;;  %v415_v0 = vmul.f32 %v406_v62, %v406_v62 }
  0xb4   : > { %v410_v1 = vadd.f32 %v409_v63, %v406_v62  ;;  %v416_v2 = vrot.slane %v415_v0, 4 }
  0xb6   : > { %v411_v3 = vrot.slane %v410_v1, 2  ;;  %v417_v4 = vadd.f32 %v416_v2, %v415_v0 }
  0xb8   : > { %v412_v5 = vadd.f32 %v411_v3, %v410_v1  ;;  %v418_v6 = vrot.slane %v417_v4, 2 }
  0xba   : > { %v413_v7 = vrot.slane %v412_v5, 1  ;;  %v419_v8 = vadd.f32 %v418_v6, %v417_v4 }
  0xbc   : > { %v420_v9 = vrot.slane %v419_v8, 1  ;;  %v414_v10 = vadd.f32 %v413_v7, %v412_v5 }
  0xbe   : > { %v421_v11 = vadd.f32 %v420_v9, %v419_v8 }
  0xc0   : > { %v422_v12 = vsel %vm290_vm0, %v414_v10, %v421_v11 }
  0xc1   : > { %423 = vst [vmem:[%s274_s23] sm:$0x3] %v422_v12 }
  0xc2 PF: > { %s18_s21 = sadd.s32 1, %s599_s21  }
  0xc3   : > { %p15_p7 = scmp.ge.s32.totalorder %s18_s21, 4  }
  0xc5   :  { %17 = sbr.rel (!%p15_p7) target bundleno = 1 (0x1), region = 87 }
  0xca   :  { %457 = vsyncpa [#allocation3], 1 }
  0xcb   :  { %459 = vsyncpa [#allocation3 + $0x1], 1 }

</bundles_post_ra>
